<compile_context>
chip_gen: v7x
topology: tpu7x:2x2x1
jax: 0.10.0
libtpu: 0.0.40
codegen_flags: <defaults>
</compile_context>

<pallas_src>
import functools

import jax
import jax.numpy as jnp
from jax.experimental import pallas as pl
from jax.experimental.pallas import tpu as pltpu


# ----------------------------- Pallas kernel ------------------------------

def _fused_kernel(x_ref, wc_ref, bc_ref, wh_ref, bh_ref, o_ref, *, num_actions):
    # conv (as dense matmul) + bias + ReLU; features already in PyTorch
    # (C, H, W) flatten order, so no transpose is needed.
    feats = jnp.maximum(
        jnp.dot(x_ref[...], wc_ref[...], preferred_element_type=jnp.float32)
        + bc_ref[...],
        0.0,
    )
    # merged heads: action logits in cols [0, A), critic in col A, rest zero.
    slab = (jnp.dot(feats, wh_ref[...], preferred_element_type=jnp.float32)
            + bh_ref[...])
    # softmax over the BATCH axis (dim=0, as in the PyTorch module); columns
    # are independent so softmaxing the whole lane-dense slab is safe, and we
    # keep the raw value for the critic column via a lane select.
    m = jnp.max(slab, axis=0, keepdims=True)
    e = jnp.exp(slab - m)
    inv = pl.reciprocal(jnp.sum(e, axis=0, keepdims=True), approx=False)
    probs = e * inv
    col = jax.lax.broadcasted_iota(jnp.int32, slab.shape, 1)
    o_ref[...] = jnp.where(col < num_actions, probs, slab)


def _full(shape):
    # whole-array block (small shapes; full-extent blocks satisfy tiling rules)
    return pl.BlockSpec(shape, lambda i: (0,) * len(shape))


# ------------------------------- forward ----------------------------------

@functools.partial(jax.jit, static_argnames=("num_actions",))
def actor_critic_forward(x, wc, bc, wh, bh, *, num_actions):
    if x.ndim < 4:
        x = x[None]
    B = x.shape[0]
    x_flat = x.reshape(B, -1)                      # (B, C*H*W), contiguous NCHW flatten
    npad = wh.shape[1]                             # 128-lane padded head width

    slab = pl.pallas_call(
        functools.partial(_fused_kernel, num_actions=num_actions),
        out_shape=jax.ShapeDtypeStruct((B, npad), jnp.float32),
        grid=(1,),
        in_specs=[_full(x_flat.shape), _full(wc.shape), _full(bc.shape),
                  _full(wh.shape), _full(bh.shape)],
        out_specs=_full((B, npad)),
        compiler_params=pltpu.CompilerParams(dimension_semantics=("arbitrary",)),
    )(x_flat, wc, bc, wh, bh)

    probs = slab[:, :num_actions]
    critic = slab[:, num_actions:num_actions + 1]
    return probs, critic


# ------------------------- params / weight prep ---------------------------

def init_params(key, num_actions):
    ks = jax.random.split(key, 6)

    def u(k, shape, fan_in):
        bound = 1.0 / jnp.sqrt(jnp.float32(fan_in))
        return jax.random.uniform(k, shape, jnp.float32, -bound, bound)

    return dict(
        conv_w=u(ks[0], (16, 4, 3, 3), 4 * 9),
        conv_b=u(ks[1], (16,), 4 * 9),
        action_w=u(ks[2], (num_actions, 1024), 1024),
        action_b=u(ks[3], (num_actions,), 1024),
        critic_w=u(ks[4], (1, 1024), 1024),
        critic_b=u(ks[5], (1,), 1024),
    )


def prepare_params(params, input_hw=(10, 10)):
    """One-time weight plumbing: unroll conv to a dense matrix, merge heads."""
    conv_w = params["conv_w"].astype(jnp.float32)          # (OC, C, KH, KW)
    conv_b = params["conv_b"].astype(jnp.float32)
    OC, C, KH, KW = conv_w.shape
    H, W = input_hw
    OH, OW = H - KH + 1, W - KW + 1

    # Selection tensors: Sh[kh, ih, oh] = 1 iff ih == oh + kh (and same for W).
    Sh = (jnp.arange(H)[None, :, None]
          == (jnp.arange(KH)[:, None, None]
              + jnp.arange(OH)[None, None, :])).astype(jnp.float32)   # (KH,H,OH)
    Sw = (jnp.arange(W)[None, :, None]
          == (jnp.arange(KW)[:, None, None]
              + jnp.arange(OW)[None, None, :])).astype(jnp.float32)   # (KW,W,OW)

    # Wc[c*H*W + ih*W + iw, oc*OH*OW + oh*OW + ow] = conv_w[oc, c, ih-oh, iw-ow]
    wc = jnp.einsum("ocpq,phm,qwn->chwomn", conv_w, Sh, Sw)
    wc = wc.reshape(C * H * W, OC * OH * OW)                           # (400, 1024)
    bc = jnp.repeat(conv_b, OH * OW)[None, :]                          # (1, 1024)

    # Merge action + critic heads into one lane-dense, zero-padded slab.
    action_w = params["action_w"].astype(jnp.float32)                  # (A, 1024)
    action_b = params["action_b"].astype(jnp.float32)
    critic_w = params["critic_w"].astype(jnp.float32)                  # (1, 1024)
    critic_b = params["critic_b"].astype(jnp.float32)
    A = action_w.shape[0]
    F = action_w.shape[1]
    npad = max(128, ((A + 1 + 127) // 128) * 128)

    wh = jnp.zeros((F, npad), jnp.float32)
    wh = wh.at[:, :A].set(action_w.T)
    wh = wh.at[:, A].set(critic_w[0])
    bh = jnp.zeros((1, npad), jnp.float32)
    bh = bh.at[0, :A].set(action_b)
    bh = bh.at[0, A].set(critic_b[0])

    return dict(wc=wc, bc=bc, wh=wh, bh=bh, num_actions=A)


# ------------------------------ reference ----------------------------------

def reference_forward(x, params):
    if x.ndim < 4:
        x = x[None]
    conv = jax.lax.conv_general_dilated(
        x, params["conv_w"], (1, 1), "VALID",
        dimension_numbers=("NCHW", "OIHW", "NCHW"))
    conv = jax.nn.relu(conv + params["conv_b"][None, :, None, None])
    f = conv.reshape(conv.shape[0], -1)
    logits = f @ params["action_w"].T + params["action_b"]
    critic = f @ params["critic_w"].T + params["critic_b"]
    return jax.nn.softmax(logits, axis=0), critic


# --------------------------------- main ------------------------------------

if __name__ == "__main__":
    num_actions = 6
    key = jax.random.PRNGKey(0)
    kx, kp = jax.random.split(key)

    # (H-2)*(W-2)*16 must equal 1024 -> H = W = 10
    x = jax.random.normal(kx, (2, 4, 10, 10), dtype=jnp.float32)
    params = init_params(kp, num_actions)
    prepped = prepare_params(params, input_hw=(10, 10))

    probs, critic = actor_critic_forward(
        x, prepped["wc"], prepped["bc"], prepped["wh"], prepped["bh"],
        num_actions=prepped["num_actions"])
    jax.block_until_ready((probs, critic))

    ref_probs, ref_critic = reference_forward(x, params)
    assert probs.shape == (2, num_actions) and critic.shape == (2, 1)
    assert jnp.allclose(probs, ref_probs, atol=1e-4, rtol=1e-4)
    assert jnp.allclose(critic, ref_critic, atol=1e-4, rtol=1e-4)

    print("KERNEL_OK")
</pallas_src>

<mosaic_0001>
module attributes {stable_mosaic.version = 11 : i64} {
  func.func @_fused_kernel(%arg0: i32, %arg1: memref<2x400xf32, #tpu.memory_space<vmem>>, %arg2: memref<400x1024xf32, #tpu.memory_space<vmem>>, %arg3: memref<1x1024xf32, #tpu.memory_space<vmem>>, %arg4: memref<1024x128xf32, #tpu.memory_space<vmem>>, %arg5: memref<1x128xf32, #tpu.memory_space<vmem>>, %arg6: memref<2x128xf32, #tpu.memory_space<vmem>>) attributes {dimension_semantics = [#tpu.dimension_semantics<arbitrary>], iteration_bounds = array<i64: 1>, scalar_prefetch = 0 : i64, scratch_operands = 0 : i64, tpu.core_type = #tpu.core_type<tc>, window_params = [{pipeline_mode = #tpu.pipeline_mode<synchronous>, transform_indices = @transform_0, window_bounds = array<i64: 2, 400>}, {pipeline_mode = #tpu.pipeline_mode<synchronous>, transform_indices = @transform_1, window_bounds = array<i64: 400, 1024>}, {pipeline_mode = #tpu.pipeline_mode<synchronous>, transform_indices = @transform_2, window_bounds = array<i64: 1, 1024>}, {pipeline_mode = #tpu.pipeline_mode<synchronous>, transform_indices = @transform_3, window_bounds = array<i64: 1024, 128>}, {pipeline_mode = #tpu.pipeline_mode<synchronous>, transform_indices = @transform_4, window_bounds = array<i64: 1, 128>}, {pipeline_mode = #tpu.pipeline_mode<synchronous>, transform_indices = @transform_5, window_bounds = array<i64: 2, 128>}]} {
    %c0 = arith.constant 0 : index
    %c0_0 = arith.constant 0 : index
    %0 = vector.load %arg1[%c0, %c0_0] : memref<2x400xf32, #tpu.memory_space<vmem>>, vector<2x400xf32>
    %c0_1 = arith.constant 0 : index
    %c0_2 = arith.constant 0 : index
    %1 = vector.load %arg2[%c0_1, %c0_2] : memref<400x1024xf32, #tpu.memory_space<vmem>>, vector<400x1024xf32>
    %cst = arith.constant dense<0.000000e+00> : vector<2x1024xf32>
    %2 = tpu.matmul %0, %1, %cst {dimension_numbers = #tpu.dot_dimension_numbers<[1], [0], [0], [1], [0, 0, 1, 1], [], []>} : vector<2x400xf32>, vector<400x1024xf32>, vector<2x1024xf32> -> vector<2x1024xf32>
    %c0_3 = arith.constant 0 : index
    %c0_4 = arith.constant 0 : index
    %3 = vector.load %arg3[%c0_3, %c0_4] : memref<1x1024xf32, #tpu.memory_space<vmem>>, vector<1x1024xf32>
    %4 = vector.broadcast %3 : vector<1x1024xf32> to vector<2x1024xf32>
    %5 = arith.addf %2, %4 : vector<2x1024xf32>
    %cst_5 = arith.constant 0.000000e+00 : f32
    %6 = vector.broadcast %cst_5 : f32 to vector<2x1024xf32>
    %7 = arith.maximumf %5, %6 : vector<2x1024xf32>
    %c0_6 = arith.constant 0 : index
    %c0_7 = arith.constant 0 : index
    %8 = vector.load %arg4[%c0_6, %c0_7] : memref<1024x128xf32, #tpu.memory_space<vmem>>, vector<1024x128xf32>
    %cst_8 = arith.constant dense<0.000000e+00> : vector<2x128xf32>
    %9 = tpu.matmul %7, %8, %cst_8 {dimension_numbers = #tpu.dot_dimension_numbers<[1], [0], [0], [1], [0, 0, 1, 1], [], []>} : vector<2x1024xf32>, vector<1024x128xf32>, vector<2x128xf32> -> vector<2x128xf32>
    %c0_9 = arith.constant 0 : index
    %c0_10 = arith.constant 0 : index
    %10 = vector.load %arg5[%c0_9, %c0_10] : memref<1x128xf32, #tpu.memory_space<vmem>>, vector<1x128xf32>
    %11 = vector.broadcast %10 : vector<1x128xf32> to vector<2x128xf32>
    %12 = arith.addf %9, %11 : vector<2x128xf32>
    %cst_11 = arith.constant dense<0xFF800000> : vector<128xf32>
    %13 = vector.multi_reduction <maximumf>, %12, %cst_11 [0] : vector<2x128xf32> to vector<128xf32>
    %14 = vector.shape_cast %13 : vector<128xf32> to vector<1x128xf32>
    %15 = vector.broadcast %14 : vector<1x128xf32> to vector<2x128xf32>
    %16 = arith.subf %12, %15 : vector<2x128xf32>
    %17 = math.exp %16 : vector<2x128xf32>
    %cst_12 = arith.constant dense<0.000000e+00> : vector<128xf32>
    %18 = vector.multi_reduction <add>, %17, %cst_12 [0] : vector<2x128xf32> to vector<128xf32>
    %19 = vector.shape_cast %18 : vector<128xf32> to vector<1x128xf32>
    %20 = tpu.reciprocal %19 : vector<1x128xf32> -> vector<1x128xf32>
    %21 = vector.broadcast %20 : vector<1x128xf32> to vector<2x128xf32>
    %22 = arith.mulf %17, %21 : vector<2x128xf32>
    %23 = tpu.iota {dimensions = array<i32: 1>} : vector<2x128xi32>
    %c6_i32 = arith.constant 6 : i32
    %24 = vector.broadcast %c6_i32 : i32 to vector<2x128xi32>
    %25 = arith.cmpi slt, %23, %24 : vector<2x128xi32>
    %26 = arith.select %25, %22, %12 : vector<2x128xi1>, vector<2x128xf32>
    %c0_13 = arith.constant 0 : index
    %c0_14 = arith.constant 0 : index
    %27 = vector.load %arg6[%c0_13, %c0_14] : memref<2x128xf32, #tpu.memory_space<vmem>>, vector<2x128xf32>
    tpu.vector_store %arg6[%c0_13, %c0_14], %26 {strides = array<i32>} : memref<2x128xf32, #tpu.memory_space<vmem>>, vector<2x128xf32>,
    return
  }
  func.func @transform_0(%arg0: i32) -> (i32, i32) {
    %c0_i32 = arith.constant 0 : i32
    %c0_i32_0 = arith.constant 0 : i32
    %c0_i32_1 = arith.constant 0 : i32
    return %c0_i32, %c0_i32_0 : i32, i32
  }
  func.func @transform_1(%arg0: i32) -> (i32, i32) {
    %c0_i32 = arith.constant 0 : i32
    %c0_i32_0 = arith.constant 0 : i32
    %c0_i32_1 = arith.constant 0 : i32
    return %c0_i32, %c0_i32_0 : i32, i32
  }
  func.func @transform_2(%arg0: i32) -> (i32, i32) {
    %c0_i32 = arith.constant 0 : i32
    %c0_i32_0 = arith.constant 0 : i32
    %c0_i32_1 = arith.constant 0 : i32
    return %c0_i32, %c0_i32_0 : i32, i32
  }
  func.func @transform_3(%arg0: i32) -> (i32, i32) {
    %c0_i32 = arith.constant 0 : i32
    %c0_i32_0 = arith.constant 0 : i32
    %c0_i32_1 = arith.constant 0 : i32
    return %c0_i32, %c0_i32_0 : i32, i32
  }
  func.func @transform_4(%arg0: i32) -> (i32, i32) {
    %c0_i32 = arith.constant 0 : i32
    %c0_i32_0 = arith.constant 0 : i32
    %c0_i32_1 = arith.constant 0 : i32
    return %c0_i32, %c0_i32_0 : i32, i32
  }
  func.func @transform_5(%arg0: i32) -> (i32, i32) {
    %c0_i32 = arith.constant 0 : i32
    %c0_i32_0 = arith.constant 0 : i32
    %c0_i32_1 = arith.constant 0 : i32
    return %c0_i32, %c0_i32_0 : i32, i32
  }
}

</mosaic_0001>

<bundles_post_ra>
// kernel: actor_critic_forward.1
= control target key start
LH: loop header
LB: loop body
LE: loop exit
PB: predicated region body
PF: predicated region fallthrough
CT: control target
= control target key end

     0   :  { %10 = vsyncpa [#allocation3], 0  ;;  %s2522_s0 = inlined_call_operand.vmem [shape: f32[2,400], index: 0, kind: input, shape index: {}]   ;;  %s2523_s1 = inlined_call_operand.hbm [shape: f32[400,1024], index: 1, kind: input, shape index: {}]   ;;  %s2524_s2 = inlined_call_operand.hbm [shape: f32[1,1024], index: 2, kind: input, shape index: {}]   ;;  %s2525_s3 = inlined_call_operand.hbm [shape: f32[1024,128], index: 3, kind: input, shape index: {}]   ;;  %s2526_s4 = inlined_call_operand.hbm [shape: f32[1,128], index: 4, kind: input, shape index: {}]   ;;  %s2527_s5 = inlined_call_operand.vmem [shape: f32[2,128], index: 5, kind: output, shape index: {}]  }
   0x1   :  { %11 = vsyncpa [#allocation5], 0 }
   0x2   :  { %12 = vsyncpa [#allocation8], 0  ;;  %s2358_s18 = smov [#allocation4]   ;;  %s2359_s20 = smov [#allocation2]  }
   0x3   :  { %s33_s19 = sshll.u32 %s2358_s18, 4  ;;  %s20_s21 = sshll.u32 %s2359_s20, 4  ;;  %s34_s19 = int_to_ptr.vmem [resolvable:$true] %s33_s19  ;;  %s2397_s21 = int_to_ptr.vmem [resolvable:$true] %s20_s21 }
   0x4   :  { %s2264_s24 = scalar_lea.hbm %s2524_s2, 128 }
   0x5   :  { %p2265_p0 = scmp.ne.s32.totalorder %s2524_s2, %s2264_s24  ;;  %p2268_p1 = scmp.lt.u32.totalorder %s2264_s24, %s2524_s2 }
   0x7   :  { %p2270_p2 = pnand %p2268_p1, %p2265_p0 }
   0x9   :  { %2273 = shalt.err (!%p2270_p2)
}
   0xa   :  { %s2274_s29 = scalar_lea.vmem %s34_s19, 128  ;;  %p2279_p4 = scmp.lt.s32.totalorder %s34_s19, %s34_s19 }
   0xb   :  { %p2275_p3 = scmp.ne.s32.totalorder %s34_s19, %s2274_s29  ;;  %p2280_p5 = scmp.lt.s32.totalorder %s2274_s29, %s2274_s29 }
   0xd   :  { %p2281_p6 = por %p2280_p5, %p2279_p4 }
   0xf   :  { %p2282_p7 = pnand %p2281_p6, %p2275_p3 }
  0x11   :  { %2285 = shalt.err (!%p2282_p7)
}
  0x12   :  { %36 = dma.hbm_to_vmem [thread:$0]  %s2524_s2, 128, %s34_s19, [#allocation5]  }
  0x13   :  { %s2286_s9 = scalar_lea.hbm %s2523_s1, 51200 }
  0x14   :  { %p2287_p8 = scmp.ne.s32.totalorder %s2523_s1, %s2286_s9  ;;  %p2290_p9 = scmp.lt.u32.totalorder %s2286_s9, %s2523_s1 }
  0x16   :  { %p2292_p10 = pnand %p2290_p9, %p2287_p8 }
  0x18   :  { %2295 = shalt.err (!%p2292_p10)
}
  0x19   :  { %s2296_s14 = scalar_lea.vmem %s2397_s21, 51200  ;;  %p2301_p12 = scmp.lt.s32.totalorder %s2397_s21, %s2397_s21 }
  0x1a   :  { %p2297_p11 = scmp.ne.s32.totalorder %s2397_s21, %s2296_s14  ;;  %p2302_p13 = scmp.lt.s32.totalorder %s2296_s14, %s2296_s14 }
  0x1c   :  { %p2303_p0 = por %p2302_p13, %p2301_p12 }
  0x1e   :  { %p2304_p1 = pnand %p2303_p0, %p2297_p11 }
  0x20   :  { %2307 = shalt.err (!%p2304_p1)
}
  0x21   :  { %s2360_s2 = smov 1024   ;;  %s2361_s15 = smov 64  }
  0x22   :  { %26 = dma.hbm_to_vmem [thread:$0]  %s2523_s1, 51200, %s2397_s21, [#allocation3], %s2360_s2, %s2360_s2, %s2361_s15  }
  0x23   :  { %s2362_s18 = smov [#allocation6]   ;;  %s2308_s23 = scalar_lea.hbm %s2525_s3, 16384 }
  0x24   :  { %s42_s19 = sshll.u32 %s2362_s18, 4  ;;  %p2309_p2 = scmp.ne.s32.totalorder %s2525_s3, %s2308_s23  ;;  %s43_s19 = int_to_ptr.vmem [resolvable:$true] %s42_s19 }
  0x25   :  { %p2312_p3 = scmp.lt.u32.totalorder %s2308_s23, %s2525_s3 }
  0x27   :  { %p2314_p4 = pnand %p2312_p3, %p2309_p2 }
  0x29   :  { %2317 = shalt.err (!%p2314_p4)
}
  0x2a   :  { %s2318_s28 = scalar_lea.vmem %s43_s19, 16384  ;;  %p2323_p6 = scmp.lt.s32.totalorder %s43_s19, %s43_s19 }
  0x2b   :  { %p2319_p5 = scmp.ne.s32.totalorder %s43_s19, %s2318_s28  ;;  %p2324_p7 = scmp.lt.s32.totalorder %s2318_s28, %s2318_s28 }
  0x2d   :  { %p2325_p8 = por %p2324_p7, %p2323_p6 }
  0x2f   :  { %p2326_p9 = pnand %p2325_p8, %p2319_p5 }
  0x31   :  { %2329 = shalt.err (!%p2326_p9)
}
  0x32   :  { %s2363_s1 = smov 128   ;;  %s2364_s21 = smov 8  }
  0x33   :  { %48 = dma.hbm_to_vmem [thread:$0]  %s2525_s3, 16384, %s43_s19, [#allocation5], %s2363_s1, %s2363_s1, %s2364_s21  }
  0x34   :  { %s2365_s6 = smov [#allocation7]   ;;  %s2330_s10 = scalar_lea.hbm %s2526_s4, 16 }
  0x35   :  { %s55_s7 = sshll.u32 %s2365_s6, 4  ;;  %p2331_p10 = scmp.ne.s32.totalorder %s2526_s4, %s2330_s10  ;;  %s56_s7 = int_to_ptr.vmem [resolvable:$true] %s55_s7 }
  0x36   :  { %p2334_p11 = scmp.lt.u32.totalorder %s2330_s10, %s2526_s4 }
  0x38   :  { %p2336_p12 = pnand %p2334_p11, %p2331_p10 }
  0x3a   :  { %2339 = shalt.err (!%p2336_p12)
}
  0x3b   :  { %s2340_s2 = scalar_lea.vmem %s56_s7, 16  ;;  %s2344_s3 = scalar_lea.vmem %s56_s7, 32 }
  0x3c   :  { %p2341_p13 = scmp.ne.s32.totalorder %s56_s7, %s2340_s2  ;;  %p2345_p0 = scmp.lt.s32.totalorder %s56_s7, %s56_s7 }
  0x3d   :  { %p2346_p1 = scmp.lt.s32.totalorder %s2344_s3, %s2340_s2 }
  0x3f   :  { %p2347_p2 = por %p2346_p1, %p2345_p0 }
  0x41   :  { %p2348_p3 = pnand %p2347_p2, %p2341_p13 }
  0x43   :  { %2351 = shalt.err (!%p2348_p3)
}
  0x44   :  { %58 = dma.hbm_to_vmem [thread:$0]  %s2526_s4, 16, %s56_s7, [#allocation8]  }
  0x45   :  { %2352 = dma.done.wait [#allocation3], 51200  }
  0x46   :  { %2353 = vsyncadd [#allocation3], 4294916096 }
  0x47   :  { %2354 = dma.done.wait [#allocation5], 16512  }
  0x48   :  { %2355 = vsyncadd [#allocation5], 4294950784 }
  0x49   :  { %2356 = dma.done.wait [#allocation8], 16  }
  0x4a   :  { %2357 = vsyncadd [#allocation8], 4294967280  ;;  %v73_v0 = vld [vmem:[#allocation2 + $0x8] sm:$0xff]  ;;  %v75_v2 = vld [vmem:[#allocation2 + $0x18] sm:$0xff]  ;;  %vm535_vm0 = vcmask 130048   ;;  %vm1529_vm1 = vcmask 1041408  }
  0x4b   :  { %v81_v1 = vld [vmem:[#allocation2 + $0x48] sm:$0xff]  ;;  %v83_v4 = vld [vmem:[#allocation2 + $0x58] sm:$0xff]  ;;  %v72_v5 = vld [vmem:[#allocation2] sm:$0xff] }
  0x4c   :  { %v1706_v3 = vpack.c.bf16 %v81_v1, %v73_v0  ;;  %v80_v6 = vld [vmem:[#allocation2 + $0x40] sm:$0xff]  ;;  %v1806_v7 = vpack.c.bf16 %v83_v4, %v75_v2  ;;  %v74_v9 = vld [vmem:[#allocation2 + $0x10] sm:$0xff]  ;;  %v89_v11 = vld [vmem:[#allocation2 + $0x88] sm:$0xff] }
  0x4d   :  { %v1708_v8 = vpack.c.bf16 %v80_v6, %v72_v5  ;;  %v82_v10 = vld [vmem:[#allocation2 + $0x50] sm:$0xff]  ;;  %v97_v13 = vld [vmem:[#allocation2 + $0xc8] sm:$0xff]  ;;  %v91_v14 = vld [vmem:[#allocation2 + $0x98] sm:$0xff] }
  0x4e   :  { %1707 = vmatprep.subr.bf16.mxu0 %v1706_v3  ;;  %v1808_v12 = vpack.c.bf16 %v82_v10, %v74_v9  ;;  %v99_v15 = vld [vmem:[#allocation2 + $0xd8] sm:$0xff]  ;;  %1807 = vmatprep.subr.bf16.mxu1 %v1806_v7  ;;  %v1710_v16 = vpack.c.bf16 %v97_v13, %v89_v11  ;;  %v88_v18 = vld [vmem:[#allocation2 + $0x80] sm:$0xff]  ;;  %v90_v20 = vld [vmem:[#allocation2 + $0x90] sm:$0xff] }
  0x4f   :  { %1709 = vmatpush1.bf16.msra.mxu0 %v1708_v8  ;;  %v1810_v17 = vpack.c.bf16 %v99_v15, %v91_v14  ;;  %v96_v19 = vld [vmem:[#allocation2 + $0xc0] sm:$0xff]  ;;  %v98_v22 = vld [vmem:[#allocation2 + $0xd0] sm:$0xff]  ;;  %v105_v23 = vld [vmem:[#allocation2 + $0x108] sm:$0xff] }
  0x50   :  { %1809 = vmatpush1.bf16.msra.mxu1 %v1808_v12  ;;  %v1712_v21 = vpack.c.bf16 %v96_v19, %v88_v18  ;;  %v113_v24 = vld [vmem:[#allocation2 + $0x148] sm:$0xff]  ;;  %1711 = vmatprep.subr.bf16.mxu0 %v1710_v16  ;;  %v1812_v25 = vpack.c.bf16 %v98_v22, %v90_v20  ;;  %v107_v27 = vld [vmem:[#allocation2 + $0x118] sm:$0xff]  ;;  %v104_v29 = vld [vmem:[#allocation2 + $0x100] sm:$0xff] }
  0x51   :  { %1811 = vmatprep.subr.bf16.mxu1 %v1810_v17  ;;  %v1714_v26 = vpack.c.bf16 %v113_v24, %v105_v23  ;;  %v115_v28 = vld [vmem:[#allocation2 + $0x158] sm:$0xff]  ;;  %v112_v31 = vld [vmem:[#allocation2 + $0x140] sm:$0xff]  ;;  %v106_v32 = vld [vmem:[#allocation2 + $0x110] sm:$0xff] }
  0x52   :  { %v1814_v30 = vpack.c.bf16 %v115_v28, %v107_v27  ;;  %v114_v33 = vld [vmem:[#allocation2 + $0x150] sm:$0xff]  ;;  %v1716_v34 = vpack.c.bf16 %v112_v31, %v104_v29  ;;  %v121_v35 = vld [vmem:[#allocation2 + $0x188] sm:$0xff]  ;;  %v123_v37 = vld [vmem:[#allocation2 + $0x198] sm:$0xff] }
  0x53   :  { %1713 = vmatpush1.bf16.msra.mxu0 %v1712_v21  ;;  %v129_v36 = vld [vmem:[#allocation2 + $0x1c8] sm:$0xff]  ;;  %v1816_v38 = vpack.c.bf16 %v114_v33, %v106_v32  ;;  %v131_v40 = vld [vmem:[#allocation2 + $0x1d8] sm:$0xff]  ;;  %v120_v41 = vld [vmem:[#allocation2 + $0x180] sm:$0xff] }
  0x54   :  { %1813 = vmatpush1.bf16.msra.mxu1 %v1812_v25  ;;  %1715 = vmatprep.subr.bf16.mxu0 %v1714_v26  ;;  %v1718_v39 = vpack.c.bf16 %v129_v36, %v121_v35  ;;  %v128_v42 = vld [vmem:[#allocation2 + $0x1c0] sm:$0xff]  ;;  %v1818_v43 = vpack.c.bf16 %v131_v40, %v123_v37  ;;  %v122_v44 = vld [vmem:[#allocation2 + $0x190] sm:$0xff]  ;;  %v137_v46 = vld [vmem:[#allocation2 + $0x208] sm:$0xff] }
  0x55   :  { %1815 = vmatprep.subr.bf16.mxu1 %v1814_v30  ;;  %v130_v45 = vld [vmem:[#allocation2 + $0x1d0] sm:$0xff]  ;;  %v145_v47 = vld [vmem:[#allocation2 + $0x248] sm:$0xff]  ;;  %v139_v48 = vld [vmem:[#allocation2 + $0x218] sm:$0xff]  ;;  %v1720_v50 = vpack.c.bf16 %v128_v42, %v120_v41 }
  0x56   :  { %v147_v49 = vld [vmem:[#allocation2 + $0x258] sm:$0xff]  ;;  %v1820_v51 = vpack.c.bf16 %v130_v45, %v122_v44  ;;  %v1722_v52 = vpack.c.bf16 %v145_v47, %v137_v46  ;;  %v136_v53 = vld [vmem:[#allocation2 + $0x200] sm:$0xff]  ;;  %v138_v55 = vld [vmem:[#allocation2 + $0x210] sm:$0xff]  ;;  %v474_v46 = vlaneseq  ;;  %v2366_v47 = vmov 1983009808  }
  0x57   :  { %1717 = vmatpush1.bf16.msra.mxu0 %v1716_v34  ;;  %v144_v54 = vld [vmem:[#allocation2 + $0x240] sm:$0xff]  ;;  %v1822_v56 = vpack.c.bf16 %v147_v49, %v139_v48  ;;  %v146_v57 = vld [vmem:[#allocation2 + $0x250] sm:$0xff]  ;;  %v153_v58 = vld [vmem:[#allocation2 + $0x288] sm:$0xff]  ;;  %v517_v48 = vunpack.c.l.s4 %v2366_v47 }
  0x58   :  { %1817 = vmatpush1.bf16.msra.mxu1 %v1816_v38  ;;  %1719 = vmatprep.subr.bf16.mxu0 %v1718_v39  ;;  %v161_v59 = vld [vmem:[#allocation2 + $0x2c8] sm:$0xff]  ;;  %v155_v60 = vld [vmem:[#allocation2 + $0x298] sm:$0xff]  ;;  %v1724_v62 = vpack.c.bf16 %v144_v54, %v136_v53  ;;  %v1824_v63 = vpack.c.bf16 %v146_v57, %v138_v55  ;;  %v152_v1 = vld [vmem:[#allocation2 + $0x280] sm:$0xff] }
  0x59   :  { %1819 = vmatprep.subr.bf16.mxu1 %v1818_v43  ;;  %v163_v61 = vld [vmem:[#allocation2 + $0x2d8] sm:$0xff]  ;;  %v1726_v0 = vpack.c.bf16 %v161_v59, %v153_v58  ;;  %v160_v2 = vld [vmem:[#allocation2 + $0x2c0] sm:$0xff]  ;;  %v154_v3 = vld [vmem:[#allocation2 + $0x290] sm:$0xff] }
  0x5a   :  { %v1826_v4 = vpack.c.bf16 %v163_v61, %v155_v60  ;;  %v162_v5 = vld [vmem:[#allocation2 + $0x2d0] sm:$0xff]  ;;  %v169_v6 = vld [vmem:[#allocation2 + $0x308] sm:$0xff]  ;;  %v171_v8 = vld [vmem:[#allocation2 + $0x318] sm:$0xff]  ;;  %v1728_v10 = vpack.c.bf16 %v160_v2, %v152_v1  ;;  %v2453_v61 = vshrl.u32 %v474_v46, 7 }
  0x5b   :  { %1721 = vmatpush1.bf16.msra.mxu0 %v1720_v50  ;;  %v177_v7 = vld [vmem:[#allocation2 + $0x348] sm:$0xff]  ;;  %v179_v9 = vld [vmem:[#allocation2 + $0x358] sm:$0xff]  ;;  %v1828_v11 = vpack.c.bf16 %v162_v5, %v154_v3  ;;  %v168_v13 = vld [vmem:[#allocation2 + $0x300] sm:$0xff] }
  0x5c   :  { %1821 = vmatpush1.bf16.msra.mxu1 %v1820_v51  ;;  %1723 = vmatprep.subr.bf16.mxu0 %v1722_v52  ;;  %v1730_v12 = vpack.c.bf16 %v177_v7, %v169_v6  ;;  %v176_v14 = vld [vmem:[#allocation2 + $0x340] sm:$0xff]  ;;  %v170_v15 = vld [vmem:[#allocation2 + $0x310] sm:$0xff]  ;;  %v1830_v16 = vpack.c.bf16 %v179_v9, %v171_v8  ;;  %v185_v18 = vld [vmem:[#allocation2 + $0x388] sm:$0xff] }
  0x5d   :  { %1823 = vmatprep.subr.bf16.mxu1 %v1822_v56  ;;  %v178_v17 = vld [vmem:[#allocation2 + $0x350] sm:$0xff]  ;;  %v193_v19 = vld [vmem:[#allocation2 + $0x3c8] sm:$0xff]  ;;  %v187_v20 = vld [vmem:[#allocation2 + $0x398] sm:$0xff]  ;;  %v1732_v22 = vpack.c.bf16 %v176_v14, %v168_v13 }
  0x5e   :  { %v195_v21 = vld [vmem:[#allocation2 + $0x3d8] sm:$0xff]  ;;  %v1832_v23 = vpack.c.bf16 %v178_v17, %v170_v15  ;;  %v1734_v24 = vpack.c.bf16 %v193_v19, %v185_v18  ;;  %v184_v25 = vld [vmem:[#allocation2 + $0x380] sm:$0xff]  ;;  %v186_v27 = vld [vmem:[#allocation2 + $0x390] sm:$0xff] }
  0x5f   :  { %1725 = vmatpush1.bf16.msra.mxu0 %v1724_v62  ;;  %v192_v26 = vld [vmem:[#allocation2 + $0x3c0] sm:$0xff]  ;;  %v1834_v28 = vpack.c.bf16 %v195_v21, %v187_v20  ;;  %v194_v29 = vld [vmem:[#allocation2 + $0x3d0] sm:$0xff]  ;;  %v201_v30 = vld [vmem:[#allocation2 + $0x408] sm:$0xff]  ;;  %v518_v62 = vunpack.c.0.s8 %v517_v48 }
  0x60   :  { %1825 = vmatpush1.bf16.msra.mxu1 %v1824_v63  ;;  %1727 = vmatprep.subr.bf16.mxu0 %v1726_v0  ;;  %v209_v31 = vld [vmem:[#allocation2 + $0x448] sm:$0xff]  ;;  %v203_v32 = vld [vmem:[#allocation2 + $0x418] sm:$0xff]  ;;  %v1736_v34 = vpack.c.bf16 %v192_v26, %v184_v25  ;;  %v1836_v35 = vpack.c.bf16 %v194_v29, %v186_v27  ;;  %v200_v37 = vld [vmem:[#allocation2 + $0x400] sm:$0xff] }
  0x61   :  { %1827 = vmatprep.subr.bf16.mxu1 %v1826_v4  ;;  %v211_v33 = vld [vmem:[#allocation2 + $0x458] sm:$0xff]  ;;  %v1738_v36 = vpack.c.bf16 %v209_v31, %v201_v30  ;;  %v208_v38 = vld [vmem:[#allocation2 + $0x440] sm:$0xff]  ;;  %v202_v39 = vld [vmem:[#allocation2 + $0x410] sm:$0xff] }
  0x62   :  { %v1838_v40 = vpack.c.bf16 %v211_v33, %v203_v32  ;;  %v210_v41 = vld [vmem:[#allocation2 + $0x450] sm:$0xff]  ;;  %v217_v42 = vld [vmem:[#allocation2 + $0x488] sm:$0xff]  ;;  %v219_v44 = vld [vmem:[#allocation2 + $0x498] sm:$0xff]  ;;  %v1740_v49 = vpack.c.bf16 %v208_v38, %v200_v37 }
  0x63   :  { %1729 = vmatpush1.bf16.msra.mxu0 %v1728_v10  ;;  %v225_v43 = vld [vmem:[#allocation2 + $0x4c8] sm:$0xff]  ;;  %v227_v45 = vld [vmem:[#allocation2 + $0x4d8] sm:$0xff]  ;;  %v1840_v50 = vpack.c.bf16 %v210_v41, %v202_v39  ;;  %v216_v52 = vld [vmem:[#allocation2 + $0x480] sm:$0xff] }
  0x64   :  { %1829 = vmatpush1.bf16.msra.mxu1 %v1828_v11  ;;  %1731 = vmatprep.subr.bf16.mxu0 %v1730_v12  ;;  %v1742_v51 = vpack.c.bf16 %v225_v43, %v217_v42  ;;  %v224_v53 = vld [vmem:[#allocation2 + $0x4c0] sm:$0xff]  ;;  %v218_v54 = vld [vmem:[#allocation2 + $0x490] sm:$0xff]  ;;  %v1842_v55 = vpack.c.bf16 %v227_v45, %v219_v44  ;;  %v233_v57 = vld [vmem:[#allocation2 + $0x508] sm:$0xff]  ;;  %v2456_v11 = vsub.s32 %v518_v62, %v2453_v61 }
  0x65   :  { %1831 = vmatprep.subr.bf16.mxu1 %v1830_v16  ;;  %v226_v56 = vld [vmem:[#allocation2 + $0x4d0] sm:$0xff]  ;;  %v241_v58 = vld [vmem:[#allocation2 + $0x548] sm:$0xff]  ;;  %v235_v59 = vld [vmem:[#allocation2 + $0x518] sm:$0xff]  ;;  %v1744_v63 = vpack.c.bf16 %v224_v53, %v216_v52 }
  0x66   :  { %v243_v60 = vld [vmem:[#allocation2 + $0x558] sm:$0xff]  ;;  %v1844_v0 = vpack.c.bf16 %v226_v56, %v218_v54  ;;  %v1746_v1 = vpack.c.bf16 %v241_v58, %v233_v57  ;;  %v232_v2 = vld [vmem:[#allocation2 + $0x500] sm:$0xff]  ;;  %v234_v4 = vld [vmem:[#allocation2 + $0x510] sm:$0xff] }
  0x67   :  { %1733 = vmatpush1.bf16.msra.mxu0 %v1732_v22  ;;  %v240_v3 = vld [vmem:[#allocation2 + $0x540] sm:$0xff]  ;;  %v1846_v5 = vpack.c.bf16 %v243_v60, %v235_v59  ;;  %v242_v6 = vld [vmem:[#allocation2 + $0x550] sm:$0xff]  ;;  %v249_v7 = vld [vmem:[#allocation2 + $0x588] sm:$0xff] }
  0x68   :  { %1833 = vmatpush1.bf16.msra.mxu1 %v1832_v23  ;;  %1735 = vmatprep.subr.bf16.mxu0 %v1734_v24  ;;  %v257_v8 = vld [vmem:[#allocation2 + $0x5c8] sm:$0xff]  ;;  %v251_v9 = vld [vmem:[#allocation2 + $0x598] sm:$0xff]  ;;  %v1748_v12 = vpack.c.bf16 %v240_v3, %v232_v2  ;;  %v248_v13 = vld [vmem:[#allocation2 + $0x580] sm:$0xff]  ;;  %v1848_v14 = vpack.c.bf16 %v242_v6, %v234_v4 }
  0x69   :  { %1835 = vmatprep.subr.bf16.mxu1 %v1834_v28  ;;  %v259_v10 = vld [vmem:[#allocation2 + $0x5d8] sm:$0xff]  ;;  %v1750_v15 = vpack.c.bf16 %v257_v8, %v249_v7  ;;  %v256_v16 = vld [vmem:[#allocation2 + $0x5c0] sm:$0xff]  ;;  %v250_v17 = vld [vmem:[#allocation2 + $0x590] sm:$0xff] }
  0x6a   :  { %v258_v18 = vld [vmem:[#allocation2 + $0x5d0] sm:$0xff]  ;;  %v1850_v19 = vpack.c.bf16 %v259_v10, %v251_v9  ;;  %v265_v20 = vld [vmem:[#allocation2 + $0x608] sm:$0xff]  ;;  %v2461_v22 = vld [vmem:[%s2522_s0] sm:$0xff]  ;;  %v1752_v26 = vpack.c.bf16 %v256_v16, %v248_v13 }
  0x6b   :  { %1737 = vmatpush1.bf16.msra.mxu0 %v1736_v34  ;;  %v273_v21 = vld [vmem:[#allocation2 + $0x648] sm:$0xff]  ;;  %v267_v23 = vld [vmem:[#allocation2 + $0x618] sm:$0xff]  ;;  %v2465_v25 = vrot.slane %v2461_v22, %v2456_v11  ;;  %v1852_v27 = vpack.c.bf16 %v258_v18, %v250_v17  ;;  %v264_v29 = vld [vmem:[#allocation2 + $0x600] sm:$0xff] }
  0x6c   :  { %1837 = vmatpush1.bf16.msra.mxu1 %v1836_v35  ;;  %1739 = vmatprep.subr.bf16.mxu0 %v1738_v36  ;;  %v275_v24 = vld [vmem:[#allocation2 + $0x658] sm:$0xff]  ;;  %v1754_v28 = vpack.c.bf16 %v273_v21, %v265_v20  ;;  %v272_v30 = vld [vmem:[#allocation2 + $0x640] sm:$0xff]  ;;  %v266_v31 = vld [vmem:[#allocation2 + $0x610] sm:$0xff] }
  0x6d   :  { %1839 = vmatprep.subr.bf16.mxu1 %v1838_v40  ;;  %v2469_v32 = vcombine.high %v2465_v25, %v2465_v25  ;;  %v1854_v33 = vpack.c.bf16 %v275_v24, %v267_v23  ;;  %v274_v34 = vld [vmem:[#allocation2 + $0x650] sm:$0xff]  ;;  %v281_v35 = vld [vmem:[#allocation2 + $0x688] sm:$0xff]  ;;  %v283_v37 = vld [vmem:[#allocation2 + $0x698] sm:$0xff]  ;;  %v1756_v39 = vpack.c.bf16 %v272_v30, %v264_v29 }
  0x6e   :  { %v289_v36 = vld [vmem:[#allocation2 + $0x6c8] sm:$0xff]  ;;  %v291_v38 = vld [vmem:[#allocation2 + $0x6d8] sm:$0xff]  ;;  %v1856_v40 = vpack.c.bf16 %v274_v34, %v266_v31  ;;  %v280_v42 = vld [vmem:[#allocation2 + $0x680] sm:$0xff] }
  0x6f   :  { %1741 = vmatpush1.bf16.msra.mxu0 %v1740_v49  ;;  %602 = vmatprep.mubr.f32.mxu0 %v2469_v32  ;;  %v1758_v41 = vpack.c.bf16 %v289_v36, %v281_v35  ;;  %v288_v43 = vld [vmem:[#allocation2 + $0x6c0] sm:$0xff]  ;;  %v282_v44 = vld [vmem:[#allocation2 + $0x690] sm:$0xff]  ;;  %v1858_v45 = vpack.c.bf16 %v291_v38, %v283_v37  ;;  %v297_v48 = vld [vmem:[#allocation2 + $0x708] sm:$0xff] }
  0x70   :  { %1841 = vmatpush1.bf16.msra.mxu1 %v1840_v50  ;;  %1743 = vmatprep.subr.bf16.mxu0 %v1742_v51  ;;  %v290_v47 = vld [vmem:[#allocation2 + $0x6d0] sm:$0xff]  ;;  %v305_v49 = vld [vmem:[#allocation2 + $0x748] sm:$0xff]  ;;  %v299_v50 = vld [vmem:[#allocation2 + $0x718] sm:$0xff]  ;;  %v1760_v52 = vpack.c.bf16 %v288_v43, %v280_v42 }
  0x71   :  { %1843 = vmatprep.subr.bf16.mxu1 %v1842_v55  ;;  %744 = vmatprep.mubr.f32.mxu1 %v2469_v32  ;;  %v307_v51 = vld [vmem:[#allocation2 + $0x758] sm:$0xff]  ;;  %v1860_v53 = vpack.c.bf16 %v290_v47, %v282_v44  ;;  %v1762_v54 = vpack.c.bf16 %v305_v49, %v297_v48  ;;  %v296_v55 = vld [vmem:[#allocation2 + $0x700] sm:$0xff]  ;;  %v298_v57 = vld [vmem:[#allocation2 + $0x710] sm:$0xff] }
  0x72   :  { %v304_v56 = vld [vmem:[#allocation2 + $0x740] sm:$0xff]  ;;  %v1862_v58 = vpack.c.bf16 %v307_v51, %v299_v50  ;;  %v306_v59 = vld [vmem:[#allocation2 + $0x750] sm:$0xff]  ;;  %v313_v60 = vld [vmem:[#allocation2 + $0x788] sm:$0xff] }
  0x73   :  { %1745 = vmatpush1.bf16.msra.mxu0 %v1744_v63  ;;  %v321_v62 = vld [vmem:[#allocation2 + $0x7c8] sm:$0xff]  ;;  %v315_v63 = vld [vmem:[#allocation2 + $0x798] sm:$0xff]  ;;  %v1864_v2 = vpack.c.bf16 %v306_v59, %v298_v57  ;;  %v312_v4 = vld [vmem:[#allocation2 + $0x780] sm:$0xff] }
  0x74   :  { %1845 = vmatpush1.bf16.msra.mxu1 %v1844_v0  ;;  %1747 = vmatprep.subr.bf16.mxu0 %v1746_v1  ;;  %v323_v0 = vld [vmem:[#allocation2 + $0x7d8] sm:$0xff]  ;;  %v1764_v1 = vpack.c.bf16 %v304_v56, %v296_v55  ;;  %v1766_v3 = vpack.c.bf16 %v321_v62, %v313_v60  ;;  %v314_v6 = vld [vmem:[#allocation2 + $0x790] sm:$0xff]  ;;  %v329_v9 = vld [vmem:[#allocation2 + $0x808] sm:$0xff] }
  0x75   :  { %1847 = vmatprep.subr.bf16.mxu1 %v1846_v5  ;;  %v320_v5 = vld [vmem:[#allocation2 + $0x7c0] sm:$0xff]  ;;  %v1866_v7 = vpack.c.bf16 %v323_v0, %v315_v63  ;;  %v322_v8 = vld [vmem:[#allocation2 + $0x7d0] sm:$0xff]  ;;  %v337_v10 = vld [vmem:[#allocation2 + $0x848] sm:$0xff] }
  0x76   :  { %v331_v13 = vld [vmem:[#allocation2 + $0x818] sm:$0xff]  ;;  %v1868_v16 = vpack.c.bf16 %v322_v8, %v314_v6  ;;  %v1770_v17 = vpack.c.bf16 %v337_v10, %v329_v9  ;;  %v328_v18 = vld [vmem:[#allocation2 + $0x800] sm:$0xff]  ;;  %v330_v20 = vld [vmem:[#allocation2 + $0x810] sm:$0xff] }
  0x77   :  { %1749 = vmatpush1.bf16.msra.mxu0 %v1748_v12  ;;  %v515_v12 = vcombine.high %v2461_v22, %v2461_v22  ;;  %v338_v23 = vld [vmem:[#allocation2 + $0x850] sm:$0xff]  ;;  %v345_v24 = vld [vmem:[#allocation2 + $0x888] sm:$0xff]  ;;  %v347_v22 = vld [vmem:[#allocation2 + $0x898] sm:$0xff] }
  0x78   :  { %1849 = vmatpush1.bf16.msra.mxu1 %v1848_v14  ;;  %1751 = vmatprep.subr.bf16.mxu0 %v1750_v15  ;;  %v339_v14 = vld [vmem:[#allocation2 + $0x858] sm:$0xff]  ;;  %v1768_v15 = vpack.c.bf16 %v320_v5, %v312_v4  ;;  %v1872_v30 = vpack.c.bf16 %v338_v23, %v330_v20  ;;  %v352_v34 = vld [vmem:[#allocation2 + $0x8c0] sm:$0xff]  ;;  %v346_v35 = vld [vmem:[#allocation2 + $0x890] sm:$0xff] }
  0x79   :  { %1851 = vmatprep.subr.bf16.mxu1 %v1850_v19  ;;  %v336_v19 = vld [vmem:[#allocation2 + $0x840] sm:$0xff]  ;;  %v1870_v21 = vpack.c.bf16 %v339_v14, %v331_v13  ;;  %v354_v37 = vld [vmem:[#allocation2 + $0x8d0] sm:$0xff]  ;;  %v361_v38 = vld [vmem:[#allocation2 + $0x908] sm:$0xff] }
  0x7a   :  { %v1772_v29 = vpack.c.bf16 %v336_v19, %v328_v18  ;;  %v1876_v43 = vpack.c.bf16 %v354_v37, %v346_v35  ;;  %v368_v47 = vld [vmem:[#allocation2 + $0x940] sm:$0xff]  ;;  %v362_v48 = vld [vmem:[#allocation2 + $0x910] sm:$0xff]  ;;  %v377_v51 = vld [vmem:[#allocation2 + $0x988] sm:$0xff] }
  0x7b   :  { %1753 = vmatpush1.bf16.msra.mxu0 %v1752_v26  ;;  %v353_v26 = vld [vmem:[#allocation2 + $0x8c8] sm:$0xff]  ;;  %v370_v50 = vld [vmem:[#allocation2 + $0x950] sm:$0xff]  ;;  %v384_v59 = vld [vmem:[#allocation2 + $0x9c0] sm:$0xff] }
  0x7c   :  { %1853 = vmatpush1.bf16.msra.mxu1 %v1852_v27  ;;  %1755 = vmatprep.subr.bf16.mxu0 %v1754_v28  ;;  %v2476_v27 = vrot.slane %v515_v12, %v2456_v11  ;;  %v355_v28 = vld [vmem:[#allocation2 + $0x8d8] sm:$0xff]  ;;  %v1774_v31 = vpack.c.bf16 %v353_v26, %v345_v24  ;;  %v1880_v56 = vpack.c.bf16 %v370_v50, %v362_v48  ;;  %v378_v60 = vld [vmem:[#allocation2 + $0x990] sm:$0xff]  ;;  %v393_v0 = vld [vmem:[#allocation2 + $0xa08] sm:$0xff] }
  0x7d   :  { %1855 = vmatprep.subr.bf16.mxu1 %v1854_v33  ;;  %v344_v33 = vld [vmem:[#allocation2 + $0x880] sm:$0xff]  ;;  %v1874_v36 = vpack.c.bf16 %v355_v28, %v347_v22  ;;  %v386_v63 = vld [vmem:[#allocation2 + $0x9d0] sm:$0xff]  ;;  %v409_v13 = vld [vmem:[#allocation2 + $0xa88] sm:$0xff] }
  0x7e   :  { %v2480_v11 = vcombine.high %v2476_v27, %v2476_v27  ;;  %v1776_v42 = vpack.c.bf16 %v352_v34, %v344_v33  ;;  %v1884_v5 = vpack.c.bf16 %v386_v63, %v378_v60  ;;  %v400_v8 = vld [vmem:[#allocation2 + $0xa40] sm:$0xff]  ;;  %v394_v9 = vld [vmem:[#allocation2 + $0xa10] sm:$0xff]  ;;  %v417_v14 = vld [vmem:[#allocation2 + $0xac8] sm:$0xff] }
  0x7f   :  { %1757 = vmatpush1.bf16.msra.mxu0 %v1756_v39  ;;  %v369_v39 = vld [vmem:[#allocation2 + $0x948] sm:$0xff]  ;;  %v402_v12 = vld [vmem:[#allocation2 + $0xa50] sm:$0xff]  ;;  %v1790_v19 = vpack.c.bf16 %v417_v14, %v409_v13  ;;  %v408_v20 = vld [vmem:[#allocation2 + $0xa80] sm:$0xff] }
  0x80   :  { %1857 = vmatpush1.bf16.msra.mxu1 %v1856_v40  ;;  %1759 = vmatprep.subr.bf16.mxu0 %v1758_v41  ;;  %v363_v40 = vld [vmem:[#allocation2 + $0x918] sm:$0xff]  ;;  %v1778_v44 = vpack.c.bf16 %v369_v39, %v361_v38  ;;  %v1888_v18 = vpack.c.bf16 %v402_v12, %v394_v9  ;;  %v410_v23 = vld [vmem:[#allocation2 + $0xa90] sm:$0xff]  ;;  %v425_v22 = vld [vmem:[#allocation2 + $0xb08] sm:$0xff] }
  0x81   :  { %1859 = vmatprep.subr.bf16.mxu1 %v1858_v45  ;;  %v371_v41 = vld [vmem:[#allocation2 + $0x958] sm:$0xff]  ;;  %v360_v45 = vld [vmem:[#allocation2 + $0x900] sm:$0xff]  ;;  %v418_v26 = vld [vmem:[#allocation2 + $0xad0] sm:$0xff] }
  0x82   :  { %v1878_v49 = vpack.c.bf16 %v371_v41, %v363_v40  ;;  %v1780_v55 = vpack.c.bf16 %v368_v47, %v360_v45  ;;  %v433_v28 = vld [vmem:[#allocation2 + $0xb48] sm:$0xff]  ;;  %v1892_v33 = vpack.c.bf16 %v418_v26, %v410_v23  ;;  %v424_v35 = vld [vmem:[#allocation2 + $0xb00] sm:$0xff]  ;;  %v426_v37 = vld [vmem:[#allocation2 + $0xb10] sm:$0xff] }
  0x83   :  { %1761 = vmatpush1.bf16.msra.mxu0 %v1760_v52  ;;  %v385_v52 = vld [vmem:[#allocation2 + $0x9c8] sm:$0xff]  ;;  %v1794_v34 = vpack.c.bf16 %v433_v28, %v425_v22  ;;  %v434_v39 = vld [vmem:[#allocation2 + $0xb50] sm:$0xff]  ;;  %v440_v48 = vld [vmem:[#allocation2 + $0xb80] sm:$0xff] }
  0x84   :  { %1861 = vmatpush1.bf16.msra.mxu1 %v1860_v53  ;;  %1763 = vmatprep.subr.bf16.mxu0 %v1762_v54  ;;  %v379_v53 = vld [vmem:[#allocation2 + $0x998] sm:$0xff]  ;;  %v1782_v57 = vpack.c.bf16 %v385_v52, %v377_v51  ;;  %v441_v40 = vld [vmem:[#allocation2 + $0xb88] sm:$0xff]  ;;  %v1896_v45 = vpack.c.bf16 %v434_v39, %v426_v37  ;;  %v442_v50 = vld [vmem:[#allocation2 + $0xb90] sm:$0xff] }
  0x85   :  { %1863 = vmatprep.subr.bf16.mxu1 %v1862_v58  ;;  %v387_v54 = vld [vmem:[#allocation2 + $0x9d8] sm:$0xff]  ;;  %v376_v58 = vld [vmem:[#allocation2 + $0x980] sm:$0xff]  ;;  %v449_v41 = vld [vmem:[#allocation2 + $0xbc8] sm:$0xff] }
  0x86   :  { %v1882_v62 = vpack.c.bf16 %v387_v54, %v379_v53  ;;  %v1784_v4 = vpack.c.bf16 %v384_v59, %v376_v58  ;;  %v1798_v47 = vpack.c.bf16 %v449_v41, %v441_v40  ;;  %v450_v52 = vld [vmem:[#allocation2 + $0xbd0] sm:$0xff]  ;;  %v457_v53 = vld [vmem:[#allocation2 + $0xc08] sm:$0xff]  ;;  %v456_v60 = vld [vmem:[#allocation2 + $0xc00] sm:$0xff] }
  0x87   :  { %1765 = vmatpush1.bf16.msra.mxu0 %v1764_v1  ;;  %v401_v1 = vld [vmem:[#allocation2 + $0xa48] sm:$0xff]  ;;  %v1900_v58 = vpack.c.bf16 %v450_v52, %v442_v50  ;;  %v458_v63 = vld [vmem:[#allocation2 + $0xc10] sm:$0xff]  ;;  %v76_v9 = vld [vmem:[#allocation2 + $0x20] sm:$0xff] }
  0x88   :  { %1865 = vmatpush1.bf16.msra.mxu1 %v1864_v2  ;;  %1767 = vmatprep.subr.bf16.mxu0 %v1766_v3  ;;  %v395_v2 = vld [vmem:[#allocation2 + $0xa18] sm:$0xff]  ;;  %v1786_v6 = vpack.c.bf16 %v401_v1, %v393_v0  ;;  %v465_v54 = vld [vmem:[#allocation2 + $0xc48] sm:$0xff]  ;;  %v466_v1 = vld [vmem:[#allocation2 + $0xc50] sm:$0xff] }
  0x89   :  { %1867 = vmatprep.subr.bf16.mxu1 %v1866_v7  ;;  %v403_v3 = vld [vmem:[#allocation2 + $0xa58] sm:$0xff]  ;;  %v392_v7 = vld [vmem:[#allocation2 + $0xa00] sm:$0xff]  ;;  %v1802_v59 = vpack.c.bf16 %v465_v54, %v457_v53  ;;  %v78_v12 = vld [vmem:[#allocation2 + $0x30] sm:$0xff] }
  0x8a   :  { %v1886_v10 = vpack.c.bf16 %v403_v3, %v395_v2  ;;  %v77_v2 = vld [vmem:[#allocation2 + $0x28] sm:$0xff]  ;;  %v86_v14 = vld [vmem:[#allocation2 + $0x70] sm:$0xff]  ;;  %v92_v23 = vld [vmem:[#allocation2 + $0xa0] sm:$0xff] }
  0x8b   :  { %1769 = vmatpush1.bf16.msra.mxu0 %v1768_v15  ;;  %v411_v15 = vld [vmem:[#allocation2 + $0xa98] sm:$0xff]  ;;  %v85_v3 = vld [vmem:[#allocation2 + $0x68] sm:$0xff]  ;;  %v94_v26 = vld [vmem:[#allocation2 + $0xb0] sm:$0xff] }
  0x8c   :  { %1869 = vmatpush1.bf16.msra.mxu1 %v1868_v16  ;;  %1771 = vmatprep.subr.bf16.mxu0 %v1770_v17  ;;  %v419_v16 = vld [vmem:[#allocation2 + $0xad8] sm:$0xff]  ;;  %v1788_v17 = vpack.c.bf16 %v400_v8, %v392_v7  ;;  %v1904_v7 = vpack.c.bf16 %v466_v1, %v458_v63  ;;  %v1906_v8 = vpack.c.bf16 %v85_v3, %v77_v2  ;;  %v102_v28 = vld [vmem:[#allocation2 + $0xf0] sm:$0xff]  ;;  %v108_v37 = vld [vmem:[#allocation2 + $0x120] sm:$0xff] }
  0x8d   :  { %1871 = vmatprep.subr.bf16.mxu1 %v1870_v21  ;;  %v416_v21 = vld [vmem:[#allocation2 + $0xac0] sm:$0xff]  ;;  %v1890_v24 = vpack.c.bf16 %v419_v16, %v411_v15  ;;  %v93_v15 = vld [vmem:[#allocation2 + $0xa8] sm:$0xff]  ;;  %v110_v39 = vld [vmem:[#allocation2 + $0x130] sm:$0xff] }
  0x8e   :  { %603 = vmatmul.mubr.f32.vlgmr.msra.gmra.mrb[0].mxu0 %v2465_v25  ;;  %v101_v16 = vld [vmem:[#allocation2 + $0xe8] sm:$0xff]  ;;  %v118_v41 = vld [vmem:[#allocation2 + $0x170] sm:$0xff]  ;;  %v124_v50 = vld [vmem:[#allocation2 + $0x1a0] sm:$0xff] }
  0x8f   :  { %1773 = vmatpush1.bf16.msra.mxu0 %v1772_v29  ;;  %745 = vmatmul.mubr.f32.vlgmr.msra.gmra.mrb[0].mxu1 %v2465_v25  ;;  %v427_v29 = vld [vmem:[#allocation2 + $0xb18] sm:$0xff]  ;;  %v126_v52 = vld [vmem:[#allocation2 + $0x1b0] sm:$0xff]  ;;  %v148_v63 = vld [vmem:[#allocation2 + $0x260] sm:$0xff] }
  0x90   :  { %1873 = vmatpush1.bf16.msra.mxu1 %v1872_v30  ;;  %1775 = vmatprep.subr.bf16.mxu0 %v1774_v31  ;;  %v435_v30 = vld [vmem:[#allocation2 + $0xb58] sm:$0xff]  ;;  %v1792_v31 = vpack.c.bf16 %v416_v21, %v408_v20  ;;  %v2008_v20 = vpack.c.bf16 %v86_v14, %v78_v12  ;;  %v1910_v21 = vpack.c.bf16 %v101_v16, %v93_v15  ;;  %v134_v54 = vld [vmem:[#allocation2 + $0x1f0] sm:$0xff]  ;;  %v157_v3 = vld [vmem:[#allocation2 + $0x2a8] sm:$0xff] }
  0x91   :  { %1875 = vmatprep.subr.bf16.mxu1 %v1874_v36  ;;  %1561 = vmatprep.mubr.msk.f32.mxu0 %vm535_vm0, %v2480_v11  ;;  %v432_v36 = vld [vmem:[#allocation2 + $0xb40] sm:$0xff]  ;;  %v1894_v38 = vpack.c.bf16 %v435_v30, %v427_v29  ;;  %v109_v29 = vld [vmem:[#allocation2 + $0x128] sm:$0xff]  ;;  %v150_v2 = vld [vmem:[#allocation2 + $0x270] sm:$0xff] }
  0x92   :  { %1562 = vmatprep.mubr.msk.f32.mxu1 %vm535_vm0, %v2480_v11  ;;  %v117_v30 = vld [vmem:[#allocation2 + $0x168] sm:$0xff]  ;;  %v164_v12 = vld [vmem:[#allocation2 + $0x2e0] sm:$0xff]  ;;  %v166_v15 = vld [vmem:[#allocation2 + $0x2f0] sm:$0xff] }
  0x93   :  { %1777 = vmatpush1.bf16.msra.mxu0 %v1776_v42  ;;  %v443_v42 = vld [vmem:[#allocation2 + $0xb98] sm:$0xff]  ;;  %v173_v16 = vld [vmem:[#allocation2 + $0x328] sm:$0xff] }
  0x94   :  { %1877 = vmatpush1.bf16.msra.mxu1 %v1876_v43  ;;  %1779 = vmatprep.subr.bf16.mxu0 %v1778_v44  ;;  %v451_v43 = vld [vmem:[#allocation2 + $0xbd8] sm:$0xff]  ;;  %v1796_v44 = vpack.c.bf16 %v432_v36, %v424_v35  ;;  %v2012_v35 = vpack.c.bf16 %v102_v28, %v94_v26  ;;  %v1914_v36 = vpack.c.bf16 %v117_v30, %v109_v29  ;;  %v180_v26 = vld [vmem:[#allocation2 + $0x360] sm:$0xff]  ;;  %v182_v29 = vld [vmem:[#allocation2 + $0x370] sm:$0xff] }
  0x95   :  { %1879 = vmatprep.subr.bf16.mxu1 %v1878_v49  ;;  %v448_v49 = vld [vmem:[#allocation2 + $0xbc0] sm:$0xff]  ;;  %v1898_v51 = vpack.c.bf16 %v451_v43, %v443_v42  ;;  %v125_v42 = vld [vmem:[#allocation2 + $0x1a8] sm:$0xff] }
  0x96   :  { %v133_v43 = vld [vmem:[#allocation2 + $0x1e8] sm:$0xff] }
  0x97   :  { %1781 = vmatpush1.bf16.msra.mxu0 %v1780_v55  ;;  %v459_v55 = vld [vmem:[#allocation2 + $0xc18] sm:$0xff]  ;;  %v189_v30 = vld [vmem:[#allocation2 + $0x3a8] sm:$0xff] }
  0x98   :  { %1881 = vmatpush1.bf16.msra.mxu1 %v1880_v56  ;;  %1783 = vmatprep.subr.bf16.mxu0 %v1782_v57  ;;  %v467_v56 = vld [vmem:[#allocation2 + $0xc58] sm:$0xff]  ;;  %v1800_v57 = vpack.c.bf16 %v448_v49, %v440_v48  ;;  %v2016_v48 = vpack.c.bf16 %v118_v41, %v110_v39  ;;  %v1918_v49 = vpack.c.bf16 %v133_v43, %v125_v42  ;;  %v196_v39 = vld [vmem:[#allocation2 + $0x3e0] sm:$0xff]  ;;  %v198_v42 = vld [vmem:[#allocation2 + $0x3f0] sm:$0xff] }
  0x99   :  { %1883 = vmatprep.subr.bf16.mxu1 %v1882_v62  ;;  %v464_v62 = vld [vmem:[#allocation2 + $0xc40] sm:$0xff]  ;;  %v1902_v0 = vpack.c.bf16 %v467_v56, %v459_v55  ;;  %v141_v55 = vld [vmem:[#allocation2 + $0x228] sm:$0xff] }
  0x9a   :  { %v149_v56 = vld [vmem:[#allocation2 + $0x268] sm:$0xff] }
  0x9b   :  { %1785 = vmatpush1.bf16.msra.mxu0 %v1784_v4  ;;  %v79_v4 = vld [vmem:[#allocation2 + $0x38] sm:$0xff]  ;;  %v205_v43 = vld [vmem:[#allocation2 + $0x428] sm:$0xff] }
  0x9c   :  { %1885 = vmatpush1.bf16.msra.mxu1 %v1884_v5  ;;  %1787 = vmatprep.subr.bf16.mxu0 %v1786_v6  ;;  %v87_v5 = vld [vmem:[#allocation2 + $0x78] sm:$0xff]  ;;  %v1804_v6 = vpack.c.bf16 %v464_v62, %v456_v60  ;;  %v1922_v60 = vpack.c.bf16 %v149_v56, %v141_v55  ;;  %v140_v62 = vld [vmem:[#allocation2 + $0x220] sm:$0xff]  ;;  %v214_v55 = vld [vmem:[#allocation2 + $0x470] sm:$0xff] }
  0x9d   :  { %1887 = vmatprep.subr.bf16.mxu1 %v1886_v10  ;;  %v84_v10 = vld [vmem:[#allocation2 + $0x60] sm:$0xff]  ;;  %v2006_v13 = vpack.c.bf16 %v87_v5, %v79_v4  ;;  %v165_v4 = vld [vmem:[#allocation2 + $0x2e8] sm:$0xff]  ;;  %v159_v5 = vld [vmem:[#allocation2 + $0x2b8] sm:$0xff] }
  0x9e   :  { %v221_v56 = vld [vmem:[#allocation2 + $0x4a8] sm:$0xff] }
  0x9f   :  { %1789 = vmatpush1.bf16.msra.mxu0 %v1788_v17  ;;  %v95_v17 = vld [vmem:[#allocation2 + $0xb8] sm:$0xff] }
  0xa0   :  { %1889 = vmatpush1.bf16.msra.mxu1 %v1888_v18  ;;  %1791 = vmatprep.subr.bf16.mxu0 %v1790_v19  ;;  %v103_v18 = vld [vmem:[#allocation2 + $0xf8] sm:$0xff]  ;;  %v1908_v19 = vpack.c.bf16 %v84_v10, %v76_v9  ;;  %v1926_v9 = vpack.c.bf16 %v165_v4, %v157_v3  ;;  %v156_v10 = vld [vmem:[#allocation2 + $0x2a0] sm:$0xff]  ;;  %v230_v3 = vld [vmem:[#allocation2 + $0x4f0] sm:$0xff] }
  0xa1   :  { %1891 = vmatprep.subr.bf16.mxu1 %v1890_v24  ;;  %v100_v24 = vld [vmem:[#allocation2 + $0xe0] sm:$0xff]  ;;  %v2010_v22 = vpack.c.bf16 %v103_v18, %v95_v17  ;;  %v181_v17 = vld [vmem:[#allocation2 + $0x368] sm:$0xff]  ;;  %v175_v18 = vld [vmem:[#allocation2 + $0x338] sm:$0xff] }
  0xa2   :  { %v237_v4 = vld [vmem:[#allocation2 + $0x528] sm:$0xff] }
  0xa3   :  { %1793 = vmatpush1.bf16.msra.mxu0 %v1792_v31  ;;  %v111_v31 = vld [vmem:[#allocation2 + $0x138] sm:$0xff] }
  0xa4   :  { %1893 = vmatpush1.bf16.msra.mxu1 %v1892_v33  ;;  %1795 = vmatprep.subr.bf16.mxu0 %v1794_v34  ;;  %v119_v33 = vld [vmem:[#allocation2 + $0x178] sm:$0xff]  ;;  %v1912_v34 = vpack.c.bf16 %v100_v24, %v92_v23  ;;  %v1930_v23 = vpack.c.bf16 %v181_v17, %v173_v16  ;;  %v172_v24 = vld [vmem:[#allocation2 + $0x320] sm:$0xff]  ;;  %v246_v16 = vld [vmem:[#allocation2 + $0x570] sm:$0xff] }
  0xa5   :  { %1895 = vmatprep.subr.bf16.mxu1 %v1894_v38  ;;  %v116_v38 = vld [vmem:[#allocation2 + $0x160] sm:$0xff]  ;;  %v2014_v40 = vpack.c.bf16 %v119_v33, %v111_v31  ;;  %v197_v31 = vld [vmem:[#allocation2 + $0x3e8] sm:$0xff]  ;;  %v191_v33 = vld [vmem:[#allocation2 + $0x3b8] sm:$0xff] }
  0xa6   :  { %v253_v17 = vld [vmem:[#allocation2 + $0x5a8] sm:$0xff] }
  0xa7   :  { %1797 = vmatpush1.bf16.msra.mxu0 %v1796_v44  ;;  %v127_v44 = vld [vmem:[#allocation2 + $0x1b8] sm:$0xff] }
  0xa8   :  { %1897 = vmatpush1.bf16.msra.mxu1 %v1896_v45  ;;  %1799 = vmatprep.subr.bf16.mxu0 %v1798_v47  ;;  %v135_v45 = vld [vmem:[#allocation2 + $0x1f8] sm:$0xff]  ;;  %v1916_v47 = vpack.c.bf16 %v116_v38, %v108_v37  ;;  %v1934_v37 = vpack.c.bf16 %v197_v31, %v189_v30  ;;  %v188_v38 = vld [vmem:[#allocation2 + $0x3a0] sm:$0xff]  ;;  %v262_v30 = vld [vmem:[#allocation2 + $0x5f0] sm:$0xff] }
  0xa9   :  { %1899 = vmatprep.subr.bf16.mxu1 %v1898_v51  ;;  %v132_v51 = vld [vmem:[#allocation2 + $0x1e0] sm:$0xff]  ;;  %v2018_v53 = vpack.c.bf16 %v135_v45, %v127_v44  ;;  %v213_v44 = vld [vmem:[#allocation2 + $0x468] sm:$0xff]  ;;  %v207_v45 = vld [vmem:[#allocation2 + $0x438] sm:$0xff] }
  0xaa   :  { %v269_v31 = vld [vmem:[#allocation2 + $0x628] sm:$0xff] }
  0xab   :  { %1801 = vmatpush1.bf16.msra.mxu0 %v1800_v57  ;;  %v143_v57 = vld [vmem:[#allocation2 + $0x238] sm:$0xff] }
  0xac   :  { %1901 = vmatpush1.bf16.msra.mxu1 %v1900_v58  ;;  %1803 = vmatprep.subr.bf16.mxu0 %v1802_v59  ;;  %v151_v58 = vld [vmem:[#allocation2 + $0x278] sm:$0xff]  ;;  %v1920_v59 = vpack.c.bf16 %v132_v51, %v124_v50  ;;  %v1938_v50 = vpack.c.bf16 %v213_v44, %v205_v43  ;;  %v204_v51 = vld [vmem:[#allocation2 + $0x420] sm:$0xff]  ;;  %v278_v43 = vld [vmem:[#allocation2 + $0x670] sm:$0xff] }
  0xad   :  { %1903 = vmatprep.subr.bf16.mxu1 %v1902_v0  ;;  %v142_v0 = vld [vmem:[#allocation2 + $0x230] sm:$0xff]  ;;  %v2022_v1 = vpack.c.bf16 %v151_v58, %v143_v57  ;;  %v229_v57 = vld [vmem:[#allocation2 + $0x4e8] sm:$0xff]  ;;  %v223_v58 = vld [vmem:[#allocation2 + $0x4b8] sm:$0xff] }
  0xae   :  { %v285_v44 = vld [vmem:[#allocation2 + $0x6a8] sm:$0xff] }
  0xaf   :  { %1805 = vmatpush1.bf16.msra.mxu0 %v1804_v6  ;;  %v167_v6 = vld [vmem:[#allocation2 + $0x2f8] sm:$0xff] }
  0xb0   :  { %1905 = vmatpush1.bf16.msra.mxu1 %v1904_v7  ;;  %1907 = vmatprep.subr.bf16.mxu0 %v1906_v8  ;;  %v1924_v7 = vpack.c.bf16 %v148_v63, %v140_v62  ;;  %v2024_v8 = vpack.c.bf16 %v150_v2, %v142_v0  ;;  %v2026_v14 = vpack.c.bf16 %v167_v6, %v159_v5  ;;  %v220_v63 = vld [vmem:[#allocation2 + $0x4a0] sm:$0xff]  ;;  %v245_v5 = vld [vmem:[#allocation2 + $0x568] sm:$0xff]  ;;  %v239_v6 = vld [vmem:[#allocation2 + $0x538] sm:$0xff] }
  0xb1   :  { %2007 = vmatprep.subr.bf16.mxu1 %v2006_v13  ;;  %v158_v13 = vld [vmem:[#allocation2 + $0x2b0] sm:$0xff]  ;;  %v1942_v62 = vpack.c.bf16 %v229_v57, %v221_v56  ;;  %v228_v0 = vld [vmem:[#allocation2 + $0x4e0] sm:$0xff]  ;;  %v301_v57 = vld [vmem:[#allocation2 + $0x728] sm:$0xff] }
  0xb2   :  { %674 = vmatmul.mubr.f32.vlgmr.msra.gmra.mrb[0].mxu0 %v2476_v27  ;;  %v294_v56 = vld [vmem:[#allocation2 + $0x6f0] sm:$0xff] }
  0xb3   :  { %816 = vmatmul.mubr.f32.vlgmr.msra.gmra.mrb[0].mxu1 %v2476_v27  ;;  %1909 = vmatpush1.bf16.msra.mxu0 %v1908_v19  ;;  %v183_v19 = vld [vmem:[#allocation2 + $0x378] sm:$0xff] }
  0xb4   :  { %2009 = vmatpush1.bf16.msra.mxu1 %v2008_v20  ;;  %1911 = vmatprep.subr.bf16.mxu0 %v1910_v21  ;;  %v1928_v20 = vpack.c.bf16 %v164_v12, %v156_v10  ;;  %v2028_v21 = vpack.c.bf16 %v166_v15, %v158_v13  ;;  %v2030_v28 = vpack.c.bf16 %v183_v19, %v175_v18  ;;  %v236_v12 = vld [vmem:[#allocation2 + $0x520] sm:$0xff]  ;;  %v261_v18 = vld [vmem:[#allocation2 + $0x5e8] sm:$0xff]  ;;  %v255_v19 = vld [vmem:[#allocation2 + $0x5b8] sm:$0xff] }
  0xb5   :  { %2011 = vmatprep.subr.bf16.mxu1 %v2010_v22  ;;  %886 = vmatprep.mubr.f32.mxu0 %v2469_v32  ;;  %v174_v22 = vld [vmem:[#allocation2 + $0x330] sm:$0xff]  ;;  %v1946_v10 = vpack.c.bf16 %v245_v5, %v237_v4  ;;  %v244_v13 = vld [vmem:[#allocation2 + $0x560] sm:$0xff]  ;;  %v317_v5 = vld [vmem:[#allocation2 + $0x7a8] sm:$0xff] }
  0xb6   :  { %1028 = vmatprep.mubr.f32.mxu1 %v2469_v32  ;;  %v2020_v32 = vpack.c.bf16 %v134_v54, %v126_v52  ;;  %v212_v52 = vld [vmem:[#allocation2 + $0x460] sm:$0xff]  ;;  %v310_v4 = vld [vmem:[#allocation2 + $0x770] sm:$0xff] }
  0xb7   :  { %1913 = vmatpush1.bf16.msra.mxu0 %v1912_v34  ;;  %v199_v34 = vld [vmem:[#allocation2 + $0x3f8] sm:$0xff] }
  0xb8   :  { %2013 = vmatpush1.bf16.msra.mxu1 %v2012_v35  ;;  %1915 = vmatprep.subr.bf16.mxu0 %v1914_v36  ;;  %v1932_v35 = vpack.c.bf16 %v180_v26, %v172_v24  ;;  %v2032_v36 = vpack.c.bf16 %v182_v29, %v174_v22  ;;  %v2034_v41 = vpack.c.bf16 %v199_v34, %v191_v33  ;;  %v252_v26 = vld [vmem:[#allocation2 + $0x5a0] sm:$0xff]  ;;  %v277_v33 = vld [vmem:[#allocation2 + $0x668] sm:$0xff]  ;;  %v271_v34 = vld [vmem:[#allocation2 + $0x638] sm:$0xff] }
  0xb9   :  { %2015 = vmatprep.subr.bf16.mxu1 %v2014_v40  ;;  %v190_v40 = vld [vmem:[#allocation2 + $0x3b0] sm:$0xff]  ;;  %v1950_v24 = vpack.c.bf16 %v261_v18, %v253_v17  ;;  %v260_v22 = vld [vmem:[#allocation2 + $0x5e0] sm:$0xff]  ;;  %v333_v18 = vld [vmem:[#allocation2 + $0x828] sm:$0xff] }
  0xba   :  { %v326_v17 = vld [vmem:[#allocation2 + $0x7f0] sm:$0xff] }
  0xbb   :  { %1917 = vmatpush1.bf16.msra.mxu0 %v1916_v47  ;;  %v215_v47 = vld [vmem:[#allocation2 + $0x478] sm:$0xff] }
  0xbc   :  { %2017 = vmatpush1.bf16.msra.mxu1 %v2016_v48  ;;  %1919 = vmatprep.subr.bf16.mxu0 %v1918_v49  ;;  %v1936_v48 = vpack.c.bf16 %v196_v39, %v188_v38  ;;  %v2036_v49 = vpack.c.bf16 %v198_v42, %v190_v40  ;;  %v2038_v54 = vpack.c.bf16 %v215_v47, %v207_v45  ;;  %v268_v39 = vld [vmem:[#allocation2 + $0x620] sm:$0xff]  ;;  %v293_v45 = vld [vmem:[#allocation2 + $0x6e8] sm:$0xff]  ;;  %v287_v47 = vld [vmem:[#allocation2 + $0x6b8] sm:$0xff] }
  0xbd   :  { %2019 = vmatprep.subr.bf16.mxu1 %v2018_v53  ;;  %v206_v53 = vld [vmem:[#allocation2 + $0x430] sm:$0xff]  ;;  %v1954_v38 = vpack.c.bf16 %v277_v33, %v269_v31  ;;  %v276_v40 = vld [vmem:[#allocation2 + $0x660] sm:$0xff]  ;;  %v349_v33 = vld [vmem:[#allocation2 + $0x8a8] sm:$0xff] }
  0xbe   :  { %v342_v31 = vld [vmem:[#allocation2 + $0x870] sm:$0xff] }
  0xbf   :  { %1921 = vmatpush1.bf16.msra.mxu0 %v1920_v59  ;;  %v231_v59 = vld [vmem:[#allocation2 + $0x4f8] sm:$0xff] }
  0xc0   :  { %2021 = vmatpush1.bf16.msra.mxu1 %v2020_v32  ;;  %1923 = vmatprep.subr.bf16.mxu0 %v1922_v60  ;;  %v1940_v32 = vpack.c.bf16 %v212_v52, %v204_v51  ;;  %v2040_v60 = vpack.c.bf16 %v214_v55, %v206_v53  ;;  %v2042_v2 = vpack.c.bf16 %v231_v59, %v223_v58  ;;  %v284_v52 = vld [vmem:[#allocation2 + $0x6a0] sm:$0xff]  ;;  %v309_v58 = vld [vmem:[#allocation2 + $0x768] sm:$0xff]  ;;  %v303_v59 = vld [vmem:[#allocation2 + $0x738] sm:$0xff] }
  0xc1   :  { %2023 = vmatprep.subr.bf16.mxu1 %v2022_v1  ;;  %v222_v1 = vld [vmem:[#allocation2 + $0x4b0] sm:$0xff]  ;;  %v1958_v51 = vpack.c.bf16 %v293_v45, %v285_v44  ;;  %v292_v53 = vld [vmem:[#allocation2 + $0x6e0] sm:$0xff]  ;;  %v365_v45 = vld [vmem:[#allocation2 + $0x928] sm:$0xff] }
  0xc2   :  { %v358_v44 = vld [vmem:[#allocation2 + $0x8f0] sm:$0xff] }
  0xc3   :  { %1925 = vmatpush1.bf16.msra.mxu0 %v1924_v7  ;;  %v247_v7 = vld [vmem:[#allocation2 + $0x578] sm:$0xff] }
  0xc4   :  { %2025 = vmatpush1.bf16.msra.mxu1 %v2024_v8  ;;  %1927 = vmatprep.subr.bf16.mxu0 %v1926_v9  ;;  %v1944_v8 = vpack.c.bf16 %v228_v0, %v220_v63  ;;  %v2044_v9 = vpack.c.bf16 %v230_v3, %v222_v1  ;;  %v2046_v15 = vpack.c.bf16 %v247_v7, %v239_v6  ;;  %v300_v0 = vld [vmem:[#allocation2 + $0x720] sm:$0xff]  ;;  %v325_v6 = vld [vmem:[#allocation2 + $0x7e8] sm:$0xff]  ;;  %v319_v7 = vld [vmem:[#allocation2 + $0x7b8] sm:$0xff] }
  0xc5   :  { %2027 = vmatprep.subr.bf16.mxu1 %v2026_v14  ;;  %v238_v14 = vld [vmem:[#allocation2 + $0x530] sm:$0xff]  ;;  %v1962_v63 = vpack.c.bf16 %v309_v58, %v301_v57  ;;  %v308_v1 = vld [vmem:[#allocation2 + $0x760] sm:$0xff]  ;;  %v381_v58 = vld [vmem:[#allocation2 + $0x9a8] sm:$0xff] }
  0xc6   :  { %v374_v57 = vld [vmem:[#allocation2 + $0x970] sm:$0xff] }
  0xc7   :  { %1929 = vmatpush1.bf16.msra.mxu0 %v1928_v20  ;;  %v263_v20 = vld [vmem:[#allocation2 + $0x5f8] sm:$0xff] }
  0xc8   :  { %2029 = vmatpush1.bf16.msra.mxu1 %v2028_v21  ;;  %1931 = vmatprep.subr.bf16.mxu0 %v1930_v23  ;;  %v1948_v21 = vpack.c.bf16 %v244_v13, %v236_v12  ;;  %v2048_v23 = vpack.c.bf16 %v246_v16, %v238_v14  ;;  %v2050_v29 = vpack.c.bf16 %v263_v20, %v255_v19  ;;  %v316_v13 = vld [vmem:[#allocation2 + $0x7a0] sm:$0xff]  ;;  %v341_v19 = vld [vmem:[#allocation2 + $0x868] sm:$0xff]  ;;  %v335_v20 = vld [vmem:[#allocation2 + $0x838] sm:$0xff] }
  0xc9   :  { %2031 = vmatprep.subr.bf16.mxu1 %v2030_v28  ;;  %v254_v28 = vld [vmem:[#allocation2 + $0x5b0] sm:$0xff]  ;;  %v1966_v12 = vpack.c.bf16 %v325_v6, %v317_v5  ;;  %v324_v14 = vld [vmem:[#allocation2 + $0x7e0] sm:$0xff]  ;;  %v397_v5 = vld [vmem:[#allocation2 + $0xa28] sm:$0xff] }
  0xca   :  { %v405_v6 = vld [vmem:[#allocation2 + $0xa68] sm:$0xff] }
  0xcb   :  { %1933 = vmatpush1.bf16.msra.mxu0 %v1932_v35  ;;  %v279_v35 = vld [vmem:[#allocation2 + $0x678] sm:$0xff] }
  0xcc   :  { %2033 = vmatpush1.bf16.msra.mxu1 %v2032_v36  ;;  %1935 = vmatprep.subr.bf16.mxu0 %v1934_v37  ;;  %v1952_v36 = vpack.c.bf16 %v260_v22, %v252_v26  ;;  %v2052_v37 = vpack.c.bf16 %v262_v30, %v254_v28  ;;  %v2054_v42 = vpack.c.bf16 %v279_v35, %v271_v34  ;;  %v332_v22 = vld [vmem:[#allocation2 + $0x820] sm:$0xff]  ;;  %v357_v34 = vld [vmem:[#allocation2 + $0x8e8] sm:$0xff]  ;;  %v351_v35 = vld [vmem:[#allocation2 + $0x8b8] sm:$0xff] }
  0xcd   :  { %2035 = vmatprep.subr.bf16.mxu1 %v2034_v41  ;;  %v270_v41 = vld [vmem:[#allocation2 + $0x630] sm:$0xff]  ;;  %v1970_v26 = vpack.c.bf16 %v341_v19, %v333_v18  ;;  %v340_v28 = vld [vmem:[#allocation2 + $0x860] sm:$0xff]  ;;  %v421_v18 = vld [vmem:[#allocation2 + $0xae8] sm:$0xff] }
  0xce   :  { %v415_v19 = vld [vmem:[#allocation2 + $0xab8] sm:$0xff] }
  0xcf   :  { %1937 = vmatpush1.bf16.msra.mxu0 %v1936_v48  ;;  %v295_v48 = vld [vmem:[#allocation2 + $0x6f8] sm:$0xff] }
  0xd0   :  { %2037 = vmatpush1.bf16.msra.mxu1 %v2036_v49  ;;  %1939 = vmatprep.subr.bf16.mxu0 %v1938_v50  ;;  %v1956_v49 = vpack.c.bf16 %v276_v40, %v268_v39  ;;  %v2056_v50 = vpack.c.bf16 %v278_v43, %v270_v41  ;;  %v2058_v55 = vpack.c.bf16 %v295_v48, %v287_v47  ;;  %v348_v40 = vld [vmem:[#allocation2 + $0x8a0] sm:$0xff]  ;;  %v373_v47 = vld [vmem:[#allocation2 + $0x968] sm:$0xff]  ;;  %v367_v48 = vld [vmem:[#allocation2 + $0x938] sm:$0xff] }
  0xd1   :  { %2039 = vmatprep.subr.bf16.mxu1 %v2038_v54  ;;  %v286_v54 = vld [vmem:[#allocation2 + $0x6b0] sm:$0xff]  ;;  %v1974_v39 = vpack.c.bf16 %v357_v34, %v349_v33  ;;  %v356_v41 = vld [vmem:[#allocation2 + $0x8e0] sm:$0xff]  ;;  %v437_v33 = vld [vmem:[#allocation2 + $0xb68] sm:$0xff] }
  0xd2   :  { %v431_v34 = vld [vmem:[#allocation2 + $0xb38] sm:$0xff] }
  0xd3   :  { %1941 = vmatpush1.bf16.msra.mxu0 %v1940_v32  ;;  %v311_v32 = vld [vmem:[#allocation2 + $0x778] sm:$0xff] }
  0xd4   :  { %2041 = vmatpush1.bf16.msra.mxu1 %v2040_v60  ;;  %1943 = vmatprep.subr.bf16.mxu0 %v1942_v62  ;;  %v1960_v60 = vpack.c.bf16 %v292_v53, %v284_v52  ;;  %v2060_v62 = vpack.c.bf16 %v294_v56, %v286_v54  ;;  %v2062_v3 = vpack.c.bf16 %v311_v32, %v303_v59  ;;  %v364_v53 = vld [vmem:[#allocation2 + $0x920] sm:$0xff]  ;;  %v389_v59 = vld [vmem:[#allocation2 + $0x9e8] sm:$0xff]  ;;  %v383_v32 = vld [vmem:[#allocation2 + $0x9b8] sm:$0xff] }
  0xd5   :  { %2043 = vmatprep.subr.bf16.mxu1 %v2042_v2  ;;  %v302_v2 = vld [vmem:[#allocation2 + $0x730] sm:$0xff]  ;;  %v1978_v52 = vpack.c.bf16 %v373_v47, %v365_v45  ;;  %v372_v54 = vld [vmem:[#allocation2 + $0x960] sm:$0xff]  ;;  %v453_v45 = vld [vmem:[#allocation2 + $0xbe8] sm:$0xff] }
  0xd6   :  { %v447_v47 = vld [vmem:[#allocation2 + $0xbb8] sm:$0xff] }
  0xd7   :  { %1945 = vmatpush1.bf16.msra.mxu0 %v1944_v8  ;;  %v327_v8 = vld [vmem:[#allocation2 + $0x7f8] sm:$0xff] }
  0xd8   :  { %2045 = vmatpush1.bf16.msra.mxu1 %v2044_v9  ;;  %1947 = vmatprep.subr.bf16.mxu0 %v1946_v10  ;;  %v1964_v9 = vpack.c.bf16 %v308_v1, %v300_v0  ;;  %v2064_v10 = vpack.c.bf16 %v310_v4, %v302_v2  ;;  %v2066_v16 = vpack.c.bf16 %v327_v8, %v319_v7  ;;  %v380_v0 = vld [vmem:[#allocation2 + $0x9a0] sm:$0xff]  ;;  %v382_v2 = vld [vmem:[#allocation2 + $0x9b0] sm:$0xff]  ;;  %v399_v7 = vld [vmem:[#allocation2 + $0xa38] sm:$0xff] }
  0xd9   :  { %2047 = vmatprep.subr.bf16.mxu1 %v2046_v15  ;;  %v318_v15 = vld [vmem:[#allocation2 + $0x7b0] sm:$0xff]  ;;  %v388_v1 = vld [vmem:[#allocation2 + $0x9e0] sm:$0xff]  ;;  %v407_v8 = vld [vmem:[#allocation2 + $0xa78] sm:$0xff] }
  0xda   :  { %v390_v4 = vld [vmem:[#allocation2 + $0x9f0] sm:$0xff] }
  0xdb   :  { %1949 = vmatpush1.bf16.msra.mxu0 %v1948_v21  ;;  %v343_v21 = vld [vmem:[#allocation2 + $0x878] sm:$0xff] }
  0xdc   :  { %2049 = vmatpush1.bf16.msra.mxu1 %v2048_v23  ;;  %1951 = vmatprep.subr.bf16.mxu0 %v1950_v24  ;;  %v1968_v23 = vpack.c.bf16 %v324_v14, %v316_v13  ;;  %v2068_v24 = vpack.c.bf16 %v326_v17, %v318_v15  ;;  %v2070_v30 = vpack.c.bf16 %v343_v21, %v335_v20  ;;  %v404_v13 = vld [vmem:[#allocation2 + $0xa60] sm:$0xff]  ;;  %v398_v14 = vld [vmem:[#allocation2 + $0xa30] sm:$0xff]  ;;  %v413_v17 = vld [vmem:[#allocation2 + $0xaa8] sm:$0xff] }
  0xdd   :  { %2051 = vmatprep.subr.bf16.mxu1 %v2050_v29  ;;  %v334_v29 = vld [vmem:[#allocation2 + $0x830] sm:$0xff]  ;;  %v2086_v15 = vpack.c.bf16 %v407_v8, %v399_v7  ;;  %v423_v20 = vld [vmem:[#allocation2 + $0xaf8] sm:$0xff] }
  0xde   :  { %v1163_v7 = vld [vmem:[#allocation6 + $0x188] sm:$0xff] }
  0xdf   :  { %1953 = vmatpush1.bf16.msra.mxu0 %v1952_v36  ;;  %v359_v36 = vld [vmem:[#allocation2 + $0x8f8] sm:$0xff] }
  0xe0   :  { %2053 = vmatpush1.bf16.msra.mxu1 %v2052_v37  ;;  %1955 = vmatprep.subr.bf16.mxu0 %v1954_v38  ;;  %v1972_v37 = vpack.c.bf16 %v340_v28, %v332_v22  ;;  %v2072_v38 = vpack.c.bf16 %v342_v31, %v334_v29  ;;  %v2074_v43 = vpack.c.bf16 %v359_v36, %v351_v35  ;;  %v420_v22 = vld [vmem:[#allocation2 + $0xae0] sm:$0xff]  ;;  %v414_v28 = vld [vmem:[#allocation2 + $0xab0] sm:$0xff]  ;;  %v429_v31 = vld [vmem:[#allocation2 + $0xb28] sm:$0xff] }
  0xe1   :  { %2055 = vmatprep.subr.bf16.mxu1 %v2054_v42  ;;  %v350_v42 = vld [vmem:[#allocation2 + $0x8b0] sm:$0xff]  ;;  %v2090_v29 = vpack.c.bf16 %v423_v20, %v415_v19  ;;  %v439_v35 = vld [vmem:[#allocation2 + $0xb78] sm:$0xff]  ;;  %v1165_v19 = vld [vmem:[#allocation6 + $0x198] sm:$0xff] }
  0xe3   :  { %1957 = vmatpush1.bf16.msra.mxu0 %v1956_v49  ;;  %v375_v49 = vld [vmem:[#allocation2 + $0x978] sm:$0xff] }
  0xe4   :  { %2057 = vmatpush1.bf16.msra.mxu1 %v2056_v50  ;;  %1959 = vmatprep.subr.bf16.mxu0 %v1958_v51  ;;  %v1976_v50 = vpack.c.bf16 %v356_v41, %v348_v40  ;;  %v2076_v51 = vpack.c.bf16 %v358_v44, %v350_v42  ;;  %v2078_v56 = vpack.c.bf16 %v375_v49, %v367_v48  ;;  %v436_v40 = vld [vmem:[#allocation2 + $0xb60] sm:$0xff]  ;;  %v430_v41 = vld [vmem:[#allocation2 + $0xb30] sm:$0xff]  ;;  %v445_v44 = vld [vmem:[#allocation2 + $0xba8] sm:$0xff] }
  0xe5   :  { %2059 = vmatprep.subr.bf16.mxu1 %v2058_v55  ;;  %v366_v55 = vld [vmem:[#allocation2 + $0x930] sm:$0xff]  ;;  %v2094_v42 = vpack.c.bf16 %v439_v35, %v431_v34  ;;  %v455_v48 = vld [vmem:[#allocation2 + $0xbf8] sm:$0xff] }
  0xe6   :  { %v1167_v34 = vld [vmem:[#allocation6 + $0x1a8] sm:$0xff] }
  0xe7   :  { %1961 = vmatpush1.bf16.msra.mxu0 %v1960_v60  ;;  %v391_v60 = vld [vmem:[#allocation2 + $0x9f8] sm:$0xff] }
  0xe8   :  { %2061 = vmatpush1.bf16.msra.mxu1 %v2060_v62  ;;  %1963 = vmatprep.subr.bf16.mxu0 %v1962_v63  ;;  %v2080_v62 = vpack.c.bf16 %v374_v57, %v366_v55  ;;  %v1982_v63 = vpack.c.bf16 %v389_v59, %v381_v58  ;;  %v2098_v55 = vpack.c.bf16 %v455_v48, %v447_v47  ;;  %v461_v57 = vld [vmem:[#allocation2 + $0xc28] sm:$0xff]  ;;  %v463_v59 = vld [vmem:[#allocation2 + $0xc38] sm:$0xff]  ;;  %v1169_v47 = vld [vmem:[#allocation6 + $0x1b8] sm:$0xff] }
  0xe9   :  { %2063 = vmatprep.subr.bf16.mxu1 %v2062_v3  ;;  %v2082_v3 = vpack.c.bf16 %v391_v60, %v383_v32  ;;  %v469_v58 = vld [vmem:[#allocation2 + $0xc68] sm:$0xff]  ;;  %v471_v32 = vld [vmem:[#allocation2 + $0xc78] sm:$0xff] }
  0xeb   :  { %1965 = vmatpush1.bf16.msra.mxu0 %v1964_v9  ;;  %v1984_v9 = vpack.c.bf16 %v388_v1, %v380_v0  ;;  %v468_v0 = vld [vmem:[#allocation2 + $0xc60] sm:$0xff]  ;;  %v462_v1 = vld [vmem:[#allocation2 + $0xc30] sm:$0xff] }
  0xec   :  { %2065 = vmatpush1.bf16.msra.mxu1 %v2064_v10  ;;  %1967 = vmatprep.subr.bf16.mxu0 %v1966_v12  ;;  %v1986_v10 = vpack.c.bf16 %v405_v6, %v397_v5  ;;  %v396_v12 = vld [vmem:[#allocation2 + $0xa20] sm:$0xff]  ;;  %v1131_v5 = vld [vmem:[#allocation6 + $0x88] sm:$0xff]  ;;  %v1162_v6 = vld [vmem:[#allocation6 + $0x180] sm:$0xff] }
  0xed   :  { %2067 = vmatprep.subr.bf16.mxu1 %v2066_v16  ;;  %v406_v16 = vld [vmem:[#allocation2 + $0xa70] sm:$0xff]  ;;  %v1988_v21 = vpack.c.bf16 %v404_v13, %v396_v12  ;;  %v1146_v13 = vld [vmem:[#allocation6 + $0x100] sm:$0xff] }
  0xee   :  { %v1115_v12 = vld [vmem:[#allocation6 + $0x8] sm:$0xff] }
  0xef   :  { %1969 = vmatpush1.bf16.msra.mxu0 %v1968_v23  ;;  %v2088_v23 = vpack.c.bf16 %v406_v16, %v398_v14  ;;  %v2138_v14 = vpack.c.bf16 %v1163_v7, %v1162_v6  ;;  %v1132_v16 = vld [vmem:[#allocation6 + $0x90] sm:$0xff] }
  0xf0   :  { %2069 = vmatpush1.bf16.msra.mxu1 %v2068_v24  ;;  %1971 = vmatprep.subr.bf16.mxu0 %v1970_v26  ;;  %v1990_v24 = vpack.c.bf16 %v421_v18, %v413_v17  ;;  %v412_v26 = vld [vmem:[#allocation2 + $0xaa0] sm:$0xff]  ;;  %v1164_v18 = vld [vmem:[#allocation6 + $0x190] sm:$0xff] }
  0xf1   :  { %2071 = vmatprep.subr.bf16.mxu1 %v2070_v30  ;;  %v422_v30 = vld [vmem:[#allocation2 + $0xaf0] sm:$0xff]  ;;  %v1992_v36 = vpack.c.bf16 %v420_v22, %v412_v26  ;;  %v1133_v17 = vld [vmem:[#allocation6 + $0x98] sm:$0xff]  ;;  %v1148_v22 = vld [vmem:[#allocation6 + $0x110] sm:$0xff] }
  0xf2   :  { %887 = vmatmul.mubr.f32.vlgmr.msra.gmra.mrb[2].mxu0 %v2465_v25  ;;  %v1117_v26 = vld [vmem:[#allocation6 + $0x18] sm:$0xff] }
  0xf3   :  { %1973 = vmatpush1.bf16.msra.mxu0 %v1972_v37  ;;  %1029 = vmatmul.mubr.f32.vlgmr.msra.gmra.mrb[2].mxu1 %v2465_v25  ;;  %v1980_v25 = vpack.c.bf16 %v372_v54, %v364_v53  ;;  %v2092_v37 = vpack.c.bf16 %v422_v30, %v414_v28  ;;  %v452_v53 = vld [vmem:[#allocation2 + $0xbe0] sm:$0xff]  ;;  %v446_v54 = vld [vmem:[#allocation2 + $0xbb0] sm:$0xff]  ;;  %v2142_v28 = vpack.c.bf16 %v1165_v19, %v1164_v18  ;;  %v1134_v30 = vld [vmem:[#allocation6 + $0xa0] sm:$0xff] }
  0xf4   :  { %2073 = vmatpush1.bf16.msra.mxu1 %v2072_v38  ;;  %1975 = vmatprep.subr.bf16.mxu0 %v1974_v39  ;;  %v1994_v38 = vpack.c.bf16 %v437_v33, %v429_v31  ;;  %v428_v39 = vld [vmem:[#allocation2 + $0xb20] sm:$0xff]  ;;  %v1135_v31 = vld [vmem:[#allocation6 + $0xa8] sm:$0xff]  ;;  %v1166_v33 = vld [vmem:[#allocation6 + $0x1a0] sm:$0xff] }
  0xf5   :  { %2075 = vmatprep.subr.bf16.mxu1 %v2074_v43  ;;  %1563 = vmatprep.mubr.msk.f32.mxu0 %vm535_vm0, %v2480_v11  ;;  %v438_v43 = vld [vmem:[#allocation2 + $0xb70] sm:$0xff]  ;;  %v1996_v49 = vpack.c.bf16 %v436_v40, %v428_v39  ;;  %v1150_v40 = vld [vmem:[#allocation6 + $0x120] sm:$0xff] }
  0xf6   :  { %1564 = vmatprep.mubr.msk.f32.mxu1 %vm535_vm0, %v2480_v11  ;;  %v2084_v11 = vpack.c.bf16 %v390_v4, %v382_v2  ;;  %v2102_v2 = vpack.c.bf16 %v471_v32, %v463_v59  ;;  %v1130_v4 = vld [vmem:[#allocation6 + $0x80] sm:$0xff]  ;;  %v1119_v39 = vld [vmem:[#allocation6 + $0x28] sm:$0xff] }
  0xf7   :  { %1977 = vmatpush1.bf16.msra.mxu0 %v1976_v50  ;;  %v2096_v50 = vpack.c.bf16 %v438_v43, %v430_v41  ;;  %v2146_v41 = vpack.c.bf16 %v1167_v34, %v1166_v33  ;;  %v1136_v43 = vld [vmem:[#allocation6 + $0xb0] sm:$0xff] }
  0xf8   :  { %2077 = vmatpush1.bf16.msra.mxu1 %v2076_v51  ;;  %1979 = vmatprep.subr.bf16.mxu0 %v1978_v52  ;;  %v1998_v51 = vpack.c.bf16 %v453_v45, %v445_v44  ;;  %v444_v52 = vld [vmem:[#allocation2 + $0xba0] sm:$0xff]  ;;  %v1168_v45 = vld [vmem:[#allocation6 + $0x1b0] sm:$0xff] }
  0xf9   :  { %2079 = vmatprep.subr.bf16.mxu1 %v2078_v56  ;;  %v454_v56 = vld [vmem:[#allocation2 + $0xbf0] sm:$0xff]  ;;  %v2000_v60 = vpack.c.bf16 %v452_v53, %v444_v52  ;;  %v1137_v44 = vld [vmem:[#allocation6 + $0xb8] sm:$0xff]  ;;  %v1152_v52 = vld [vmem:[#allocation6 + $0x130] sm:$0xff]  ;;  %v2150_v53 = vpack.c.bf16 %v1169_v47, %v1168_v45 }
  0xfb   :  { %1981 = vmatpush1.bf16.msra.mxu0 %v1980_v25  ;;  %v2100_v25 = vpack.c.bf16 %v454_v56, %v446_v54  ;;  %v1153_v54 = vld [vmem:[#allocation6 + $0x138] sm:$0xff]  ;;  %v1139_v56 = vld [vmem:[#allocation6 + $0xc8] sm:$0xff] }
  0xfc   :  { %2081 = vmatpush1.bf16.msra.mxu1 %v2080_v62  ;;  %1983 = vmatprep.subr.bf16.mxu0 %v1982_v63  ;;  %v2002_v62 = vpack.c.bf16 %v469_v58, %v461_v57  ;;  %v460_v63 = vld [vmem:[#allocation2 + $0xc20] sm:$0xff]  ;;  %v1170_v57 = vld [vmem:[#allocation6 + $0x1c0] sm:$0xff]  ;;  %v1171_v58 = vld [vmem:[#allocation6 + $0x1c8] sm:$0xff]  ;;  %v2152_v32 = vpack.c.bf16 %v1153_v54, %v1152_v52  ;;  %v480_v52 = vsub.s32 1, %v2453_v61 }
  0xfd   :  { %2083 = vmatprep.subr.bf16.mxu1 %v2082_v3  ;;  %v470_v3 = vld [vmem:[#allocation2 + $0xc70] sm:$0xff]  ;;  %v2004_v8 = vpack.c.bf16 %v468_v0, %v460_v63  ;;  %v1154_v63 = vld [vmem:[#allocation6 + $0x140] sm:$0xff]  ;;  %v2154_v0 = vpack.c.bf16 %v1171_v58, %v1170_v57 }
  0xff   :  { %1985 = vmatpush1.bf16.msra.mxu0 %v1984_v9  ;;  %v2104_v9 = vpack.c.bf16 %v470_v3, %v462_v1  ;;  %v1155_v1 = vld [vmem:[#allocation6 + $0x148] sm:$0xff]  ;;  %v1141_v3 = vld [vmem:[#allocation6 + $0xd8] sm:$0xff] }
 0x100   :  { %2085 = vmatpush1.bf16.msra.mxu1 %v2084_v11  ;;  %1987 = vmatprep.subr.bf16.mxu0 %v1986_v10  ;;  %v2106_v11 = vpack.c.bf16 %v1131_v5, %v1130_v4  ;;  %v1114_v10 = vld [vmem:[#allocation6] sm:$0xff]  ;;  %v1172_v4 = vld [vmem:[#allocation6 + $0x1d0] sm:$0xff]  ;;  %v1173_v5 = vld [vmem:[#allocation6 + $0x1d8] sm:$0xff]  ;;  %v2156_v7 = vpack.c.bf16 %v1155_v1, %v1154_v63 }
 0x101   :  { %2087 = vmatprep.subr.bf16.mxu1 %v2086_v15  ;;  %v1147_v15 = vld [vmem:[#allocation6 + $0x108] sm:$0xff]  ;;  %v2108_v20 = vpack.c.bf16 %v1115_v12, %v1114_v10  ;;  %v1156_v10 = vld [vmem:[#allocation6 + $0x150] sm:$0xff]  ;;  %v2158_v12 = vpack.c.bf16 %v1173_v5, %v1172_v4  ;;  %v1210_v63 = vld [vmem:[#allocation6 + $0x300] sm:$0xff] }
 0x102   :  { %v1196_v4 = vld [vmem:[#allocation6 + $0x290] sm:$0xff]  ;;  %v1197_v5 = vld [vmem:[#allocation6 + $0x298] sm:$0xff] }
 0x103   :  { %1989 = vmatpush1.bf16.msra.mxu0 %v1988_v21  ;;  %v2140_v21 = vpack.c.bf16 %v1147_v15, %v1146_v13  ;;  %v1157_v13 = vld [vmem:[#allocation6 + $0x158] sm:$0xff]  ;;  %v1143_v15 = vld [vmem:[#allocation6 + $0xe8] sm:$0xff] }
 0x104   :  { %2089 = vmatpush1.bf16.msra.mxu1 %v2088_v23  ;;  %1991 = vmatprep.subr.bf16.mxu0 %v1990_v24  ;;  %v2110_v23 = vpack.c.bf16 %v1133_v17, %v1132_v16  ;;  %v1116_v24 = vld [vmem:[#allocation6 + $0x10] sm:$0xff]  ;;  %v1174_v16 = vld [vmem:[#allocation6 + $0x1e0] sm:$0xff]  ;;  %v1175_v17 = vld [vmem:[#allocation6 + $0x1e8] sm:$0xff]  ;;  %v2160_v19 = vpack.c.bf16 %v1157_v13, %v1156_v10 }
 0x105   :  { %2091 = vmatprep.subr.bf16.mxu1 %v2090_v29  ;;  %v1149_v29 = vld [vmem:[#allocation6 + $0x118] sm:$0xff]  ;;  %v2112_v35 = vpack.c.bf16 %v1117_v26, %v1116_v24  ;;  %v1158_v24 = vld [vmem:[#allocation6 + $0x160] sm:$0xff]  ;;  %v2162_v26 = vpack.c.bf16 %v1175_v17, %v1174_v16  ;;  %v1212_v17 = vld [vmem:[#allocation6 + $0x310] sm:$0xff] }
 0x106   :  { %v1181_v16 = vld [vmem:[#allocation6 + $0x218] sm:$0xff] }
 0x107   :  { %1993 = vmatpush1.bf16.msra.mxu0 %v1992_v36  ;;  %v2144_v36 = vpack.c.bf16 %v1149_v29, %v1148_v22  ;;  %v1159_v22 = vld [vmem:[#allocation6 + $0x168] sm:$0xff]  ;;  %v1145_v29 = vld [vmem:[#allocation6 + $0xf8] sm:$0xff] }
 0x108   :  { %2093 = vmatpush1.bf16.msra.mxu1 %v2092_v37  ;;  %1995 = vmatprep.subr.bf16.mxu0 %v1994_v38  ;;  %v2114_v37 = vpack.c.bf16 %v1135_v31, %v1134_v30  ;;  %v1118_v38 = vld [vmem:[#allocation6 + $0x20] sm:$0xff]  ;;  %v1176_v30 = vld [vmem:[#allocation6 + $0x1f0] sm:$0xff]  ;;  %v1177_v31 = vld [vmem:[#allocation6 + $0x1f8] sm:$0xff]  ;;  %v2164_v34 = vpack.c.bf16 %v1159_v22, %v1158_v24 }
 0x109   :  { %2095 = vmatprep.subr.bf16.mxu1 %v2094_v42  ;;  %v1151_v42 = vld [vmem:[#allocation6 + $0x128] sm:$0xff]  ;;  %v2116_v48 = vpack.c.bf16 %v1119_v39, %v1118_v38  ;;  %v1160_v38 = vld [vmem:[#allocation6 + $0x170] sm:$0xff]  ;;  %v2166_v39 = vpack.c.bf16 %v1177_v31, %v1176_v30  ;;  %v1230_v24 = vld [vmem:[#allocation6 + $0x3a0] sm:$0xff] }
 0x10a   :  { %v1182_v30 = vld [vmem:[#allocation6 + $0x220] sm:$0xff]  ;;  %v1183_v31 = vld [vmem:[#allocation6 + $0x228] sm:$0xff] }
 0x10b   :  { %1997 = vmatpush1.bf16.msra.mxu0 %v1996_v49  ;;  %v2118_v49 = vpack.c.bf16 %v1137_v44, %v1136_v43  ;;  %v1226_v43 = vld [vmem:[#allocation6 + $0x380] sm:$0xff]  ;;  %v1227_v44 = vld [vmem:[#allocation6 + $0x388] sm:$0xff] }
 0x10c   :  { %2097 = vmatpush1.bf16.msra.mxu1 %v2096_v50  ;;  %1999 = vmatprep.subr.bf16.mxu0 %v1998_v51  ;;  %v1120_v50 = vld [vmem:[#allocation6 + $0x30] sm:$0xff]  ;;  %v1121_v51 = vld [vmem:[#allocation6 + $0x38] sm:$0xff] }
 0x10d   :  { %2099 = vmatprep.subr.bf16.mxu1 %v2098_v55  ;;  %v1138_v55 = vld [vmem:[#allocation6 + $0xc0] sm:$0xff]  ;;  %v2120_v59 = vpack.c.bf16 %v1121_v51, %v1120_v50  ;;  %v2501_v50 = vld [vmem:[#allocation4] sm:$0xff]  ;;  %v484_v51 = vsub.s32 2, %v2453_v61 }
 0x10f   :  { %2001 = vmatpush1.bf16.msra.mxu0 %v2000_v60  ;;  %v2122_v60 = vpack.c.bf16 %v1139_v56, %v1138_v55  ;;  %v485_v55 = vrot.slane %v2501_v50, %v484_v51  ;;  %v481_v56 = vrot.slane %v2501_v50, %v480_v52  ;;  %v1234_v51 = vld [vmem:[#allocation6 + $0x3c0] sm:$0xff]  ;;  %v1235_v52 = vld [vmem:[#allocation6 + $0x3c8] sm:$0xff] }
 0x110   :  { %2101 = vmatpush1.bf16.msra.mxu1 %v2100_v25  ;;  %2003 = vmatprep.subr.bf16.mxu0 %v2002_v62  ;;  %v1122_v25 = vld [vmem:[#allocation6 + $0x40] sm:$0xff]  ;;  %v1123_v62 = vld [vmem:[#allocation6 + $0x48] sm:$0xff] }
 0x111   :  { %2103 = vmatprep.subr.bf16.mxu1 %v2102_v2  ;;  %v1140_v2 = vld [vmem:[#allocation6 + $0xd0] sm:$0xff]  ;;  %v2124_v6 = vpack.c.bf16 %v1123_v62, %v1122_v25  ;;  %v1178_v25 = vld [vmem:[#allocation6 + $0x200] sm:$0xff]  ;;  %v1179_v62 = vld [vmem:[#allocation6 + $0x208] sm:$0xff] }
 0x113   :  { %2005 = vmatpush1.bf16.msra.mxu0 %v2004_v8  ;;  %v2126_v8 = vpack.c.bf16 %v1141_v3, %v1140_v2  ;;  %v1211_v3 = vld [vmem:[#allocation6 + $0x308] sm:$0xff] }
 0x114   :  { %2105 = vmatpush1.bf16.msra.mxu1 %v2104_v9  ;;  %2107 = vmatprep.subr.bf16.mxu0 %v2106_v11  ;;  %v1124_v9 = vld [vmem:[#allocation6 + $0x50] sm:$0xff]  ;;  %v1125_v11 = vld [vmem:[#allocation6 + $0x58] sm:$0xff]  ;;  %v2204_v13 = vpack.c.bf16 %v1211_v3, %v1210_v63 }
 0x115   :  { %2139 = vmatprep.subr.bf16.mxu1 %v2138_v14  ;;  %v1142_v14 = vld [vmem:[#allocation6 + $0xe0] sm:$0xff]  ;;  %v2128_v18 = vpack.c.bf16 %v1125_v11, %v1124_v9  ;;  %v2172_v11 = vpack.c.bf16 %v1179_v62, %v1178_v25  ;;  %v1205_v25 = vld [vmem:[#allocation6 + $0x2d8] sm:$0xff]  ;;  %v1236_v62 = vld [vmem:[#allocation6 + $0x3d0] sm:$0xff] }
 0x116   :  { %958 = vmatmul.mubr.f32.vlgmr.msra.gmra.mrb[2].mxu0 %v2476_v27  ;;  %v1237_v63 = vld [vmem:[#allocation6 + $0x3d8] sm:$0xff]  ;;  %v1188_v3 = vld [vmem:[#allocation6 + $0x250] sm:$0xff] }
 0x117   :  { %1100 = vmatmul.mubr.f32.vlgmr.msra.gmra.mrb[2].mxu1 %v2476_v27  ;;  %2109 = vmatpush3.bf16.msra.mxu0 %v2108_v20  ;;  %v2148_v27 = vpack.c.bf16 %v1151_v42, %v1150_v40  ;;  %v2130_v20 = vpack.c.bf16 %v1143_v15, %v1142_v14  ;;  %v1161_v40 = vld [vmem:[#allocation6 + $0x178] sm:$0xff]  ;;  %v1195_v42 = vld [vmem:[#allocation6 + $0x288] sm:$0xff]  ;;  %v2174_v14 = vpack.c.bf16 %v1197_v5, %v1196_v4  ;;  %v1180_v15 = vld [vmem:[#allocation6 + $0x210] sm:$0xff] }
 0x118   :  { %2141 = vmatpush3.bf16.msra.mxu1 %v2140_v21  ;;  %2111 = vmatprep.subr.bf16.mxu0 %v2110_v23  ;;  %v1126_v21 = vld [vmem:[#allocation6 + $0x60] sm:$0xff]  ;;  %v1127_v23 = vld [vmem:[#allocation6 + $0x68] sm:$0xff]  ;;  %v2168_v47 = vpack.c.bf16 %v1161_v40, %v1160_v38  ;;  %v2176_v22 = vpack.c.bf16 %v1181_v16, %v1180_v15  ;;  %v1232_v38 = vld [vmem:[#allocation6 + $0x3b0] sm:$0xff]  ;;  %v2180_v40 = vpack.c.bf16 %v1183_v31, %v1182_v30 }
 0x119   :  { %2143 = vmatprep.subr.bf16.mxu1 %v2142_v28  ;;  %v1144_v28 = vld [vmem:[#allocation6 + $0xf0] sm:$0xff]  ;;  %v2132_v33 = vpack.c.bf16 %v1127_v23, %v1126_v21  ;;  %v1198_v21 = vld [vmem:[#allocation6 + $0x2a0] sm:$0xff]  ;;  %v1199_v23 = vld [vmem:[#allocation6 + $0x2a8] sm:$0xff] }
 0x11a   :  { %v1189_v4 = vld [vmem:[#allocation6 + $0x258] sm:$0xff]  ;;  %v1220_v5 = vld [vmem:[#allocation6 + $0x350] sm:$0xff]  ;;  %v1190_v15 = vld [vmem:[#allocation6 + $0x260] sm:$0xff] }
 0x11b   :  { %2113 = vmatpush3.bf16.msra.mxu0 %v2112_v35  ;;  %v2134_v35 = vpack.c.bf16 %v1145_v29, %v1144_v28  ;;  %v2178_v29 = vpack.c.bf16 %v1199_v23, %v1198_v21  ;;  %v1191_v16 = vld [vmem:[#allocation6 + $0x268] sm:$0xff]  ;;  %v1209_v21 = vld [vmem:[#allocation6 + $0x2f8] sm:$0xff]  ;;  %v1240_v23 = vld [vmem:[#allocation6 + $0x3f0] sm:$0xff] }
 0x11c   :  { %2145 = vmatpush3.bf16.msra.mxu1 %v2144_v36  ;;  %2115 = vmatprep.subr.bf16.mxu0 %v2114_v37  ;;  %v1128_v36 = vld [vmem:[#allocation6 + $0x70] sm:$0xff]  ;;  %v1129_v37 = vld [vmem:[#allocation6 + $0x78] sm:$0xff] }
 0x11d   :  { %2147 = vmatprep.subr.bf16.mxu1 %v2146_v41  ;;  %v1194_v41 = vld [vmem:[#allocation6 + $0x280] sm:$0xff]  ;;  %v2136_v45 = vpack.c.bf16 %v1129_v37, %v1128_v36  ;;  %v1200_v36 = vld [vmem:[#allocation6 + $0x2b0] sm:$0xff]  ;;  %v1201_v37 = vld [vmem:[#allocation6 + $0x2b8] sm:$0xff] }
 0x11e   :  { %v1193_v30 = vld [vmem:[#allocation6 + $0x278] sm:$0xff] }
 0x11f   :  { %2117 = vmatpush3.bf16.msra.mxu0 %v2116_v48  ;;  %v2170_v48 = vpack.c.bf16 %v1195_v42, %v1194_v41  ;;  %v2182_v42 = vpack.c.bf16 %v1201_v37, %v1200_v36  ;;  %v492_v37 = vsub.s32 4, %v2453_v61 }
 0x120   :  { %2149 = vmatpush3.bf16.msra.mxu1 %v2148_v27  ;;  %2119 = vmatprep.subr.bf16.mxu0 %v2118_v49  ;;  %v2202_v27 = vpack.c.bf16 %v1227_v44, %v1226_v43  ;;  %v476_v49 = vsub.s32 0, %v2453_v61  ;;  %v1184_v43 = vld [vmem:[#allocation6 + $0x230] sm:$0xff]  ;;  %v1185_v44 = vld [vmem:[#allocation6 + $0x238] sm:$0xff] }
 0x121   :  { %2151 = vmatprep.subr.bf16.mxu1 %v2150_v53  ;;  %v488_v53 = vsub.s32 3, %v2453_v61 }
 0x122   :  { %v477_v54 = vrot.slane %v2501_v50, %v476_v49  ;;  %v1203_v49 = vld [vmem:[#allocation6 + $0x2c8] sm:$0xff] }
 0x123   :  { %2121 = vmatpush3.bf16.msra.mxu0 %v2120_v59  ;;  %v489_v57 = vrot.slane %v2501_v50, %v488_v53  ;;  %v2184_v53 = vpack.c.bf16 %v1185_v44, %v1184_v43 }
 0x124   :  { %2153 = vmatpush3.bf16.msra.mxu1 %v2152_v32  ;;  %2123 = vmatprep.subr.bf16.mxu0 %v2122_v60 }
 0x125   :  { %2155 = vmatprep.subr.bf16.mxu1 %v2154_v0 }
 0x127   :  { %2125 = vmatpush3.bf16.msra.mxu0 %v2124_v6 }
 0x128   :  { %2157 = vmatpush3.bf16.msra.mxu1 %v2156_v7  ;;  %2127 = vmatprep.subr.bf16.mxu0 %v2126_v8  ;;  %v1228_v7 = vld [vmem:[#allocation6 + $0x390] sm:$0xff]  ;;  %v1229_v8 = vld [vmem:[#allocation6 + $0x398] sm:$0xff] }
 0x129   :  { %2159 = vmatprep.subr.bf16.mxu1 %v2158_v12 }
 0x12b   :  { %2129 = vmatpush3.bf16.msra.mxu0 %v2128_v18 }
 0x12c   :  { %2161 = vmatpush3.bf16.msra.mxu1 %v2160_v19  ;;  %2131 = vmatprep.subr.bf16.mxu0 %v2130_v20  ;;  %v2206_v19 = vpack.c.bf16 %v1229_v8, %v1228_v7  ;;  %v1213_v20 = vld [vmem:[#allocation6 + $0x318] sm:$0xff]  ;;  %v1206_v8 = vld [vmem:[#allocation6 + $0x2e0] sm:$0xff] }
 0x12d   :  { %2163 = vmatprep.subr.bf16.mxu1 %v2162_v26  ;;  %v1231_v26 = vld [vmem:[#allocation6 + $0x3a8] sm:$0xff]  ;;  %v2208_v28 = vpack.c.bf16 %v1213_v20, %v1212_v17  ;;  %v1221_v7 = vld [vmem:[#allocation6 + $0x358] sm:$0xff]  ;;  %v1222_v17 = vld [vmem:[#allocation6 + $0x360] sm:$0xff] }
 0x12e   :  { %v1208_v20 = vld [vmem:[#allocation6 + $0x2f0] sm:$0xff] }
 0x12f   :  { %2133 = vmatpush3.bf16.msra.mxu0 %v2132_v33  ;;  %v1214_v33 = vld [vmem:[#allocation6 + $0x320] sm:$0xff] }
 0x130   :  { %2165 = vmatpush3.bf16.msra.mxu1 %v2164_v34  ;;  %2135 = vmatprep.subr.bf16.mxu0 %v2134_v35  ;;  %v2210_v34 = vpack.c.bf16 %v1231_v26, %v1230_v24  ;;  %v1215_v35 = vld [vmem:[#allocation6 + $0x328] sm:$0xff]  ;;  %v1241_v24 = vld [vmem:[#allocation6 + $0x3f8] sm:$0xff]  ;;  %v2196_v26 = vpack.c.bf16 %v1191_v16, %v1190_v15 }
 0x131   :  { %2167 = vmatprep.subr.bf16.mxu1 %v2166_v39  ;;  %v1233_v39 = vld [vmem:[#allocation6 + $0x3b8] sm:$0xff]  ;;  %v2212_v41 = vpack.c.bf16 %v1215_v35, %v1214_v33  ;;  %v2230_v31 = vpack.c.bf16 %v1241_v24, %v1240_v23  ;;  %v1224_v33 = vld [vmem:[#allocation6 + $0x370] sm:$0xff] }
 0x133   :  { %2137 = vmatpush3.bf16.msra.mxu0 %v2136_v45  ;;  %v1216_v45 = vld [vmem:[#allocation6 + $0x330] sm:$0xff] }
 0x134   :  { %2169 = vmatpush3.bf16.msra.mxu1 %v2168_v47  ;;  %2171 = vmatprep.subr.bf16.mxu0 %v2170_v48  ;;  %v2214_v47 = vpack.c.bf16 %v1233_v39, %v1232_v38  ;;  %v1217_v48 = vld [vmem:[#allocation6 + $0x338] sm:$0xff]  ;;  %v500_v38 = vsub.s32 6, %v2453_v61  ;;  %v496_v39 = vsub.s32 5, %v2453_v61 }
 0x135   :  { %2203 = vmatprep.subr.bf16.mxu1 %v2202_v27  ;;  %v1202_v27 = vld [vmem:[#allocation6 + $0x2c0] sm:$0xff] }
 0x136   :  { %v497_v43 = vrot.slane %v2501_v50, %v496_v39 }
 0x185   :  { %v675_v58 = vpop.f32.mrb[0].mxu0 }
 0x186   :  { %v2234_v59 = vadd.f32 %v675_v58, %v477_v54  ;;  %v817_v32 = vpop.f32.mrb[0].mxu1  ;;  %v677_v60 = vpop.f32.mrb[1].mxu0  ;;  %v2216_v54 = vpack.c.bf16 %v1217_v48, %v1216_v45  ;;  %v1218_v58 = vld [vmem:[#allocation6 + $0x340] sm:$0xff] }
 0x187   :  { %v2236_v0 = vadd.f32 %v817_v32, %v485_v55  ;;  %v2235_v1 = vadd.f32 %v677_v60, %v481_v56  ;;  %v819_v2 = vpop.f32.mrb[1].mxu1  ;;  %v2186_v55 = vpack.c.bf16 %v1203_v49, %v1202_v27  ;;  %v1186_v56 = vld [vmem:[#allocation6 + $0x240] sm:$0xff]  ;;  %v1219_v32 = vld [vmem:[#allocation6 + $0x348] sm:$0xff]  ;;  %v1204_v60 = vld [vmem:[#allocation6 + $0x2d0] sm:$0xff] }
 0x188   :  { %v2237_v6 = vadd.f32 %v819_v2, %v489_v57  ;;  %v1106_v10 = vmax.f32 %v2234_v59, 0.0  ;;  %v1187_v57 = vld [vmem:[#allocation6 + $0x248] sm:$0xff]  ;;  %v2218_v59 = vpack.c.bf16 %v1235_v52, %v1234_v51  ;;  %v2190_v2 = vpack.c.bf16 %v1205_v25, %v1204_v60 }
 0x189   :  { %v1107_v9 = vmax.f32 %v2235_v1, 0.0  ;;  %v1108_v18 = vmax.f32 %v2236_v0, 0.0  ;;  %v2188_v0 = vpack.c.bf16 %v1187_v57, %v1186_v56  ;;  %v2220_v1 = vpack.c.bf16 %v1219_v32, %v1218_v58 }
 0x18a   :  { %v1109_v12 = vmax.f32 %v2237_v6, 0.0  ;;  %v2222_v6 = vpack.c.bf16 %v1237_v63, %v1236_v62 }
 0x18b   :  { %1313 = vmatprep.mubr.f32.mxu0 %v1107_v9  ;;  %v1207_v9 = vld [vmem:[#allocation6 + $0x2e8] sm:$0xff] }
 0x18c   :  { %1383 = vmatprep.mubr.f32.mxu1 %v1109_v12  ;;  %1314 = vmatmul.mubr.f32.vlgmr.msra.gmra.mrb[4].mxu0 %v1106_v10  ;;  %v1239_v10 = vld [vmem:[#allocation6 + $0x3e8] sm:$0xff]  ;;  %v2192_v12 = vpack.c.bf16 %v1189_v4, %v1188_v3 }
 0x18d   :  { %1384 = vmatmul.mubr.f32.vlgmr.msra.gmra.mrb[4].mxu1 %v1108_v18  ;;  %2173 = vmatpush3.bf16.msra.mxu0 %v2172_v11  ;;  %v1238_v11 = vld [vmem:[#allocation6 + $0x3e0] sm:$0xff] }
 0x18e   :  { %2205 = vmatpush3.bf16.msra.mxu1 %v2204_v13  ;;  %2175 = vmatprep.subr.bf16.mxu0 %v2174_v14  ;;  %v2224_v13 = vpack.c.bf16 %v1221_v7, %v1220_v5  ;;  %v2194_v14 = vpack.c.bf16 %v1207_v9, %v1206_v8  ;;  %v2226_v18 = vpack.c.bf16 %v1239_v10, %v1238_v11 }
 0x18f   :  { %2207 = vmatprep.subr.bf16.mxu1 %v2206_v19  ;;  %v1223_v19 = vld [vmem:[#allocation6 + $0x368] sm:$0xff] }
 0x191   :  { %2177 = vmatpush3.bf16.msra.mxu0 %v2176_v22  ;;  %v2228_v22 = vpack.c.bf16 %v1223_v19, %v1222_v17 }
 0x192   :  { %2209 = vmatpush3.bf16.msra.mxu1 %v2208_v28  ;;  %2179 = vmatprep.subr.bf16.mxu0 %v2178_v29  ;;  %v2198_v28 = vpack.c.bf16 %v1209_v21, %v1208_v20  ;;  %v1192_v29 = vld [vmem:[#allocation6 + $0x270] sm:$0xff] }
 0x193   :  { %2211 = vmatprep.subr.bf16.mxu1 %v2210_v34  ;;  %v1225_v34 = vld [vmem:[#allocation6 + $0x378] sm:$0xff]  ;;  %v2200_v35 = vpack.c.bf16 %v1193_v30, %v1192_v29 }
 0x194   :  { %v2232_v36 = vpack.c.bf16 %v1225_v34, %v1224_v33 }
 0x195   :  { %2181 = vmatpush3.bf16.msra.mxu0 %v2180_v40  ;;  %v504_v40 = vsub.s32 7, %v2453_v61 }
 0x196   :  { %2213 = vmatpush3.bf16.msra.mxu1 %v2212_v41  ;;  %2183 = vmatprep.subr.bf16.mxu0 %v2182_v42  ;;  %v493_v41 = vrot.slane %v2501_v50, %v492_v37  ;;  %v501_v42 = vrot.slane %v2501_v50, %v500_v38 }
 0x197   :  { %2215 = vmatprep.subr.bf16.mxu1 %v2214_v47  ;;  %v505_v44 = vrot.slane %v2501_v50, %v504_v40 }
 0x199   :  { %2185 = vmatpush3.bf16.msra.mxu0 %v2184_v53 }
 0x19a   :  { %2217 = vmatpush3.bf16.msra.mxu1 %v2216_v54  ;;  %2187 = vmatprep.subr.bf16.mxu0 %v2186_v55 }
 0x19b   :  { %2219 = vmatprep.subr.bf16.mxu1 %v2218_v59  ;;  %v1565_v59 = vld [vmem:[#allocation7] ss:$0 sm:$0xff] }
 0x19d   :  { %2189 = vmatpush3.bf16.msra.mxu0 %v2188_v0 }
 0x19e   :  { %2221 = vmatpush3.bf16.msra.mxu1 %v2220_v1  ;;  %2191 = vmatprep.subr.bf16.mxu0 %v2190_v2 }
 0x19f   :  { %2223 = vmatprep.subr.bf16.mxu1 %v2222_v6 }
 0x1a1   :  { %2193 = vmatpush3.bf16.msra.mxu0 %v2192_v12 }
 0x1a2   :  { %2225 = vmatpush3.bf16.msra.mxu1 %v2224_v13  ;;  %2195 = vmatprep.subr.bf16.mxu0 %v2194_v14 }
 0x1a3   :  { %2227 = vmatprep.subr.bf16.mxu1 %v2226_v18 }
 0x1a5   :  { %2197 = vmatpush3.bf16.msra.mxu0 %v2196_v26 }
 0x1a6   :  { %2229 = vmatpush3.bf16.msra.mxu1 %v2228_v22  ;;  %2199 = vmatprep.subr.bf16.mxu0 %v2198_v28  ;;  %v1550_v22 = vand.u32 127, %v474_v46 }
 0x1a7   :  { %2231 = vmatprep.subr.bf16.mxu1 %v2230_v31 }
 0x1a8   :  { %vm1551_vm2 = vcmp.lt.s32.totalorder %v1550_v22, 6 }
 0x1a9   :  { %2201 = vmatpush3.bf16.msra.mxu0 %v2200_v35 }
 0x1aa   :  { %2233 = vmatpush3.bf16.msra.mxu1 %v2232_v36 }
 0x1e9   :  { %v959_v45 = vpop.f32.mrb[2].mxu0 }
 0x1ea   :  { %v2238_v47 = vadd.f32 %v959_v45, %v493_v41  ;;  %v1101_v48 = vpop.f32.mrb[2].mxu1  ;;  %v961_v27 = vpop.f32.mrb[3].mxu0 }
 0x1eb   :  { %v2240_v49 = vadd.f32 %v1101_v48, %v501_v42  ;;  %v2239_v51 = vadd.f32 %v961_v27, %v497_v43  ;;  %v1103_v52 = vpop.f32.mrb[3].mxu1 }
 0x1ec   :  { %v2241_v53 = vadd.f32 %v1103_v52, %v505_v44  ;;  %v1110_v55 = vmax.f32 %v2238_v47, 0.0 }
 0x1ed   :  { %v1111_v54 = vmax.f32 %v2239_v51, 0.0  ;;  %v1112_v61 = vmax.f32 %v2240_v49, 0.0 }
 0x1ee   :  { %v1113_v56 = vmax.f32 %v2241_v53, 0.0 }
 0x1ef   :  { %1453 = vmatprep.mubr.f32.mxu0 %v1111_v54 }
 0x1f0   :  { %1523 = vmatprep.mubr.f32.mxu1 %v1113_v56  ;;  %1454 = vmatmul.mubr.f32.vlgmr.msra.gmra.mrb[6].mxu0 %v1110_v55 }
 0x1f1   :  { %1524 = vmatmul.mubr.f32.vlgmr.msra.gmra.mrb[6].mxu1 %v1112_v61 }
 0x25f   :  { %v1598_v57 = vpop.f32.mrb[4].mxu0 }
 0x260   :  { %v1633_v58 = vpop.f32.mrb[4].mxu1  ;;  %v1599_v50 = vpop.f32.mrb[5].mxu0 }
 0x261   :  { %v1600_v32 = vadd.f32 %v1599_v50, %v1598_v57  ;;  %v1634_v60 = vpop.f32.mrb[5].mxu1 }
 0x262   :  { %v1635_v25 = vadd.f32 %v1634_v60, %v1633_v58 }
 0x263   :  { %v1316_v62 = vadd.f32 %v1600_v32, %v1565_v59 }
 0x265   :  { %v1386_v63 = vadd.f32 %v1635_v25, %v1316_v62 }
 0x2c3   :  { %v1668_v0 = vpop.f32.mrb[6].mxu0 }
 0x2c4   :  { %v1703_v1 = vpop.f32.mrb[6].mxu1  ;;  %v1669_v2 = vpop.f32.mrb[7].mxu0 }
 0x2c5   :  { %v1670_v3 = vadd.f32 %v1669_v2, %v1668_v0  ;;  %v1704_v4 = vpop.f32.mrb[7].mxu1 }
 0x2c6   :  { %v1705_v5 = vadd.f32 %v1704_v4, %v1703_v1 }
 0x2c7   :  { %v1456_v6 = vadd.f32 %v1670_v3, %v1386_v63 }
 0x2c9   :  { %v1526_v7 = vadd.f32 %v1705_v5, %v1456_v6 }
 0x2cb   :  { %v1530_v8 = vsel %vm1529_vm1, %v1526_v7, -inf }
 0x2cc   :  { %v1531_v9 = vrot.slane %v1530_v8, 4 }
 0x2ce   :  { %v1532_v11 = vmax.f32 %v1530_v8, %v1531_v9 }
 0x2d0   :  { %v1533_v10 = vrot.slane %v1532_v11, 2 }
 0x2d2   :  { %v1534_v12 = vmax.f32 %v1532_v11, %v1533_v10 }
 0x2d4   :  { %v1535_v13 = vrot.slane %v1534_v12, 1 }
 0x2d6   :  { %v1536_v14 = vmax.f32 %v1534_v12, %v1535_v13 }
 0x2d8   :  { %v1537_v15 = vsub.f32 %v1526_v7, %v1536_v14 }
 0x2da   :  { %v1538_v16 = vmul.f32 1.442695, %v1537_v15 }
 0x2dc   :  { %2260 = vpow2.f32 %v1538_v16 }
 0x2e6   :  { %v2261_v17 = vpop.eup %2260 }
 0x2e7   :  { %v1540_v18 = vsel %vm1529_vm1, %v2261_v17, 0.0 }
 0x2e8   :  { %v1541_v19 = vrot.slane %v1540_v18, 4 }
 0x2ea   :  { %v1542_v20 = vadd.f32 %v1541_v19, %v1540_v18 }
 0x2ec   :  { %v1543_v21 = vrot.slane %v1542_v20, 2 }
 0x2ee   :  { %v1544_v23 = vadd.f32 %v1543_v21, %v1542_v20 }
 0x2f0   :  { %v1545_v24 = vrot.slane %v1544_v23, 1 }
 0x2f2   :  { %v1546_v26 = vadd.f32 %v1545_v24, %v1544_v23 }
 0x2f4   :  { %2262 = vrcp.f32 %v1546_v26 }
 0x2fe   :  { %v2263_v28 = vpop.eup %2262 }
 0x2ff   :  { %v1548_v29 = vmul.f32 %v2263_v28, %v2261_v17 }
 0x301   :  { %v1552_v30 = vsel %vm1551_vm2, %v1548_v29, %v1526_v7 }
 0x302   :  { %1553 = vst [vmem:[%s2527_s5] sm:$0x3] %v1552_v30 }
 0x303   :  { %1558 = vsyncpa [#allocation3], 1 }
 0x304   :  { %1559 = vsyncpa [#allocation5], 1 }
 0x305   :  { %1560 = vsyncpa [#allocation8], 1 }

</bundles_post_ra>
